<compile_context>
chip_gen: v7x
topology: tpu7x:2x2x1
jax: 0.10.0
libtpu: 0.0.40
codegen_flags: <defaults>
</compile_context>

<pallas_src>
import jax
import jax.numpy as jnp
from jax.experimental import pallas as pl
from jax.experimental.pallas import tpu as pltpu  # noqa: F401  (not needed at this size)

B, T, D = 2, 8, 32          # batch, time, model size
H = 4                       # attention heads
DK = D // H                 # per-head dim
FF = 64                     # feed-forward hidden units (linear_units)
EPS = 1e-5                  # LayerNorm eps
NEG_INF = -1e30             # keep finite (avoids NaN on fully-masked rows)


def _layer_norm(x, gamma, beta):
    mean = jnp.mean(x, axis=-1, keepdims=True)
    var = jnp.mean((x - mean) ** 2, axis=-1, keepdims=True)
    return (x - mean) * jax.lax.rsqrt(var + EPS) * gamma + beta


def encoder_layer_kernel(x_ref, mask_ref, wqkv_ref, bqkv_ref, wo_ref, vec_ref,
                         w1_ref, b1_ref, w2_ref, out_ref):
    # x_ref:    (B, T, D)        mask_ref: (B, T, T)  (1.0 = attend, 0.0 = masked)
    # wqkv_ref: (3, H, D, DK)    bqkv_ref: (3, H, 1, DK)
    # wo_ref:   (H, DK, D)       vec_ref:  (6, D) = [ln1_g, ln1_b, bo, ln2_g, ln2_b, b2]
    # w1_ref:   (D, FF)          b1_ref:   (1, FF)     w2_ref: (FF, D)
    x = x_ref[...]                                  # (B, T, D)
    mask = mask_ref[...]                            # (B, T, T)

    ln1_g, ln1_b = vec_ref[0], vec_ref[1]
    bo = vec_ref[2]
    ln2_g, ln2_b = vec_ref[3], vec_ref[4]
    b2 = vec_ref[5]

    # ---------------- self-attention sub-block (pre-LN) ----------------
    residual = x
    xn = _layer_norm(x, ln1_g, ln1_b)               # (B, T, D)

    # Fold heads into the batched-matmul batch dim (BH = B*H). All reshapes /
    # broadcasts below only touch leading dims (last two dims untouched).
    BH = B * H
    xn_bh = jnp.broadcast_to(xn[:, None], (B, H, T, D)).reshape(BH, T, D)

    def _project(i):
        w = jnp.broadcast_to(wqkv_ref[i][None], (B, H, D, DK)).reshape(BH, D, DK)
        b = jnp.broadcast_to(bqkv_ref[i][None], (B, H, 1, DK)).reshape(BH, 1, DK)
        return jnp.einsum('btd,bdk->btk', xn_bh, w,
                          preferred_element_type=jnp.float32) + b

    q = _project(0)                                 # (BH, T, DK)
    k = _project(1)                                 # (BH, T, DK)
    v = _project(2)                                 # (BH, T, DK)

    # Additive mask bias, computed once for all heads (hoisted out of any loop).
    mask_bh = jnp.broadcast_to(mask[:, None], (B, H, T, T)).reshape(BH, T, T)
    bias = jnp.where(mask_bh > 0.0, 0.0, NEG_INF)

    scale = 1.0 / (DK ** 0.5)
    scores = jnp.einsum('bqd,bkd->bqk', q, k,
                        preferred_element_type=jnp.float32) * scale + bias
    m = jnp.max(scores, axis=-1, keepdims=True)
    e = jnp.exp(scores - m)
    s = jnp.sum(e, axis=-1, keepdims=True)
    # approx reciprocal -> EUP slot; trailing *mask keeps masked_fill(0.0) semantics
    attn = e * pl.reciprocal(s, approx=True) * mask_bh          # (BH, T, T)

    ctx = jnp.einsum('bqk,bkd->bqd', attn, v,
                     preferred_element_type=jnp.float32)        # (BH, T, DK)

    # Output projection: one batched matmul, then a head-sum (== concat @ Wo).
    wo_bh = jnp.broadcast_to(wo_ref[...][None], (B, H, DK, D)).reshape(BH, DK, D)
    att = jnp.einsum('btk,bkd->btd', ctx, wo_bh,
                     preferred_element_type=jnp.float32)        # (BH, T, D)
    att = jnp.sum(att.reshape(B, H, T, D), axis=1) + bo         # (B, T, D)

    x = residual + att                              # dropout = identity (eval)

    # ---------------- feed-forward sub-block (pre-LN) ----------------
    residual = x
    xn = _layer_norm(x, ln2_g, ln2_b)
    w1_b = jnp.broadcast_to(w1_ref[...][None], (B, D, FF))
    w2_b = jnp.broadcast_to(w2_ref[...][None], (B, FF, D))
    h1 = jnp.einsum('btd,bdf->btf', xn, w1_b,
                    preferred_element_type=jnp.float32) + b1_ref[...]
    h1 = jnp.maximum(h1, 0.0)                       # ReLU
    ff = jnp.einsum('btf,bfd->btd', h1, w2_b,
                    preferred_element_type=jnp.float32) + b2
    out_ref[...] = residual + ff


def transformer_encoder_layer(x, mask, params):
    """x: (B, T, D) f32, mask: (B, T, T) f32 {0,1}. Returns (out, mask, fake_cnn_cache)."""
    # TODO(synk): output_cache / streaming-chunk path of the PyTorch module is not
    # implemented (output_cache is None in the standard forward).
    # ---- wrapper-side layout plumbing (free; no compute hoisted out of the kernel) ----
    wqkv = jnp.stack([params[n].reshape(D, H, DK).transpose(1, 0, 2)
                      for n in ("wq", "wk", "wv")])                       # (3, H, D, DK)
    bqkv = jnp.stack([params[n].reshape(H, 1, DK)
                      for n in ("bq", "bk", "bv")])                       # (3, H, 1, DK)
    wo_heads = params["wo"].reshape(H, DK, D)                             # (H, DK, D)
    vecs = jnp.concatenate([params["ln1_g"], params["ln1_b"], params["bo"],
                            params["ln2_g"], params["ln2_b"], params["b2"]],
                           axis=0)                                        # (6, D)

    # Single invocation (no grid): the whole problem fits in VMEM, so serial grid
    # steps would only add pipeline/prologue overhead on one TensorCore.
    out = pl.pallas_call(
        encoder_layer_kernel,
        out_shape=jax.ShapeDtypeStruct((B, T, D), jnp.float32),
    )(x, mask, wqkv, bqkv, wo_heads, vecs,
      params["w1"], params["b1"], params["w2"])
    fake_cnn_cache = jnp.array([0.0], dtype=x.dtype)
    return out, mask, fake_cnn_cache


def reference_layer(x, mask, p):
    """Pure-JAX reference mirroring the PyTorch semantics."""
    def ln(v, g, b):
        mu = jnp.mean(v, -1, keepdims=True)
        var = jnp.mean((v - mu) ** 2, -1, keepdims=True)
        return (v - mu) / jnp.sqrt(var + EPS) * g + b

    residual = x
    xn = ln(x, p["ln1_g"], p["ln1_b"])
    q = xn @ p["wq"] + p["bq"]
    k = xn @ p["wk"] + p["bk"]
    v = xn @ p["wv"] + p["bv"]
    qh = q.reshape(B, T, H, DK).transpose(0, 2, 1, 3)
    kh = k.reshape(B, T, H, DK).transpose(0, 2, 1, 3)
    vh = v.reshape(B, T, H, DK).transpose(0, 2, 1, 3)
    scores = jnp.einsum("bhqd,bhkd->bhqk", qh, kh) / (DK ** 0.5)
    m4 = mask[:, None, :, :]
    scores = jnp.where(m4 > 0, scores, NEG_INF)
    attn = jax.nn.softmax(scores, axis=-1) * m4
    ctx = jnp.einsum("bhqk,bhkd->bhqd", attn, vh).transpose(0, 2, 1, 3).reshape(B, T, D)
    att_out = ctx @ p["wo"] + p["bo"]
    x = residual + att_out

    residual = x
    xn = ln(x, p["ln2_g"], p["ln2_b"])
    ff = jnp.maximum(xn @ p["w1"] + p["b1"], 0.0) @ p["w2"] + p["b2"]
    return residual + ff


def make_params(key):
    ks = jax.random.split(key, 8)
    s = 0.05
    return {
        "ln1_g": jnp.ones((1, D), jnp.float32),
        "ln1_b": jnp.zeros((1, D), jnp.float32),
        "wq": s * jax.random.normal(ks[0], (D, D), jnp.float32),
        "bq": jnp.zeros((1, D), jnp.float32),
        "wk": s * jax.random.normal(ks[1], (D, D), jnp.float32),
        "bk": jnp.zeros((1, D), jnp.float32),
        "wv": s * jax.random.normal(ks[2], (D, D), jnp.float32),
        "bv": jnp.zeros((1, D), jnp.float32),
        "wo": s * jax.random.normal(ks[3], (D, D), jnp.float32),
        "bo": 0.01 * jnp.ones((1, D), jnp.float32),
        "ln2_g": jnp.ones((1, D), jnp.float32),
        "ln2_b": jnp.zeros((1, D), jnp.float32),
        "w1": s * jax.random.normal(ks[4], (D, FF), jnp.float32),
        "b1": jnp.zeros((1, FF), jnp.float32),
        "w2": s * jax.random.normal(ks[5], (FF, D), jnp.float32),
        "b2": 0.01 * jnp.ones((1, D), jnp.float32),
    }


if __name__ == "__main__":
    key = jax.random.PRNGKey(0)
    kx, kp = jax.random.split(key)
    x = jax.random.normal(kx, (B, T, D), jnp.float32)

    # padding mask: batch 0 sees all 8 frames, batch 1 sees first 6
    lengths = jnp.array([T, 6])
    col = jnp.arange(T)[None, None, :] < lengths[:, None, None]     # (B, 1, T)
    mask = jnp.broadcast_to(col, (B, T, T)).astype(jnp.float32)

    params = make_params(kp)

    out, mask_out, fake_cnn_cache = transformer_encoder_layer(x, mask, params)
    out = jax.block_until_ready(out)

    ref = reference_layer(x, mask, params)
    assert out.shape == (B, T, D)
    # tolerance loosened slightly vs a pure-f32 check because the kernel uses the
    # approximate EUP reciprocal (pl.reciprocal(approx=True)) in the softmax.
    assert jnp.allclose(out, ref, atol=5e-3, rtol=5e-3), (
        "mismatch vs reference; max abs diff = %e"
        % float(jnp.max(jnp.abs(out - ref))))
    print("KERNEL_OK")
</pallas_src>

<mosaic_0001>
module attributes {stable_mosaic.version = 11 : i64} {
  func.func @encoder_layer_kernel(%arg0: memref<2x8x32xf32, #tpu.memory_space<vmem>>, %arg1: memref<2x8x8xf32, #tpu.memory_space<vmem>>, %arg2: memref<3x4x32x8xf32, #tpu.memory_space<vmem>>, %arg3: memref<3x4x1x8xf32, #tpu.memory_space<vmem>>, %arg4: memref<4x8x32xf32, #tpu.memory_space<vmem>>, %arg5: memref<6x32xf32, #tpu.memory_space<vmem>>, %arg6: memref<32x64xf32, #tpu.memory_space<vmem>>, %arg7: memref<1x64xf32, #tpu.memory_space<vmem>>, %arg8: memref<64x32xf32, #tpu.memory_space<vmem>>, %arg9: memref<2x8x32xf32, #tpu.memory_space<vmem>>) attributes {dimension_semantics = [], scalar_prefetch = 0 : i64, scratch_operands = 0 : i64, tpu.core_type = #tpu.core_type<tc>} {
    %c0 = arith.constant 0 : index
    %c0_0 = arith.constant 0 : index
    %c0_1 = arith.constant 0 : index
    %0 = vector.load %arg0[%c0, %c0_0, %c0_1] : memref<2x8x32xf32, #tpu.memory_space<vmem>>, vector<2x8x32xf32>
    %c0_2 = arith.constant 0 : index
    %c0_3 = arith.constant 0 : index
    %c0_4 = arith.constant 0 : index
    %1 = vector.load %arg1[%c0_2, %c0_3, %c0_4] : memref<2x8x8xf32, #tpu.memory_space<vmem>>, vector<2x8x8xf32>
    %c0_5 = arith.constant 0 : index
    %c0_6 = arith.constant 0 : index
    %2 = vector.load %arg5[%c0_5, %c0_6] : memref<6x32xf32, #tpu.memory_space<vmem>>, vector<1x32xf32>
    %3 = vector.shape_cast %2 : vector<1x32xf32> to vector<32xf32>
    %c1 = arith.constant 1 : index
    %c0_7 = arith.constant 0 : index
    %4 = vector.load %arg5[%c1, %c0_7] : memref<6x32xf32, #tpu.memory_space<vmem>>, vector<1x32xf32>
    %5 = vector.shape_cast %4 : vector<1x32xf32> to vector<32xf32>
    %c2 = arith.constant 2 : index
    %c0_8 = arith.constant 0 : index
    %6 = vector.load %arg5[%c2, %c0_8] : memref<6x32xf32, #tpu.memory_space<vmem>>, vector<1x32xf32>
    %7 = vector.shape_cast %6 : vector<1x32xf32> to vector<32xf32>
    %c3 = arith.constant 3 : index
    %c0_9 = arith.constant 0 : index
    %8 = vector.load %arg5[%c3, %c0_9] : memref<6x32xf32, #tpu.memory_space<vmem>>, vector<1x32xf32>
    %9 = vector.shape_cast %8 : vector<1x32xf32> to vector<32xf32>
    %c4 = arith.constant 4 : index
    %c0_10 = arith.constant 0 : index
    %10 = vector.load %arg5[%c4, %c0_10] : memref<6x32xf32, #tpu.memory_space<vmem>>, vector<1x32xf32>
    %11 = vector.shape_cast %10 : vector<1x32xf32> to vector<32xf32>
    %c5 = arith.constant 5 : index
    %c0_11 = arith.constant 0 : index
    %12 = vector.load %arg5[%c5, %c0_11] : memref<6x32xf32, #tpu.memory_space<vmem>>, vector<1x32xf32>
    %13 = vector.shape_cast %12 : vector<1x32xf32> to vector<32xf32>
    %cst = arith.constant dense<0.000000e+00> : vector<2x8xf32>
    %14 = vector.multi_reduction <add>, %0, %cst [2] : vector<2x8x32xf32> to vector<2x8xf32>
    %15 = vector.shape_cast %14 : vector<2x8xf32> to vector<2x8x1xf32>
    %cst_12 = arith.constant 3.200000e+01 : f32
    %16 = vector.broadcast %cst_12 : f32 to vector<2x8x1xf32>
    %17 = arith.divf %15, %16 : vector<2x8x1xf32>
    %18 = vector.broadcast %17 : vector<2x8x1xf32> to vector<2x8x32xf32>
    %19 = arith.subf %0, %18 : vector<2x8x32xf32>
    %20 = arith.mulf %19, %19 : vector<2x8x32xf32>
    %cst_13 = arith.constant dense<0.000000e+00> : vector<2x8xf32>
    %21 = vector.multi_reduction <add>, %20, %cst_13 [2] : vector<2x8x32xf32> to vector<2x8xf32>
    %22 = vector.shape_cast %21 : vector<2x8xf32> to vector<2x8x1xf32>
    %cst_14 = arith.constant 3.200000e+01 : f32
    %23 = vector.broadcast %cst_14 : f32 to vector<2x8x1xf32>
    %24 = arith.divf %22, %23 : vector<2x8x1xf32>
    %25 = vector.broadcast %17 : vector<2x8x1xf32> to vector<2x8x32xf32>
    %26 = arith.subf %0, %25 : vector<2x8x32xf32>
    %cst_15 = arith.constant 9.99999974E-6 : f32
    %27 = vector.broadcast %cst_15 : f32 to vector<2x8x1xf32>
    %28 = arith.addf %24, %27 : vector<2x8x1xf32>
    %29 = math.rsqrt %28 : vector<2x8x1xf32>
    %30 = vector.broadcast %29 : vector<2x8x1xf32> to vector<2x8x32xf32>
    %31 = arith.mulf %26, %30 : vector<2x8x32xf32>
    %32 = vector.shape_cast %3 : vector<32xf32> to vector<1x1x32xf32>
    %33 = vector.broadcast %32 : vector<1x1x32xf32> to vector<2x8x32xf32>
    %34 = arith.mulf %31, %33 : vector<2x8x32xf32>
    %35 = vector.shape_cast %5 : vector<32xf32> to vector<1x1x32xf32>
    %36 = vector.broadcast %35 : vector<1x1x32xf32> to vector<2x8x32xf32>
    %37 = arith.addf %34, %36 : vector<2x8x32xf32>
    %38 = vector.shape_cast %37 : vector<2x8x32xf32> to vector<2x1x8x32xf32>
    %39 = vector.shape_cast %38 : vector<2x1x8x32xf32> to vector<2x1x8x32xf32>
    %40 = vector.broadcast %39 : vector<2x1x8x32xf32> to vector<2x4x8x32xf32>
    %41 = vector.shape_cast %40 : vector<2x4x8x32xf32> to vector<8x8x32xf32>
    %c0_16 = arith.constant 0 : index
    %c0_17 = arith.constant 0 : index
    %c0_18 = arith.constant 0 : index
    %c0_19 = arith.constant 0 : index
    %42 = vector.load %arg2[%c0_16, %c0_17, %c0_18, %c0_19] : memref<3x4x32x8xf32, #tpu.memory_space<vmem>>, vector<1x4x32x8xf32>
    %43 = vector.shape_cast %42 : vector<1x4x32x8xf32> to vector<4x32x8xf32>
    %44 = vector.shape_cast %43 : vector<4x32x8xf32> to vector<1x4x32x8xf32>
    %45 = vector.shape_cast %44 : vector<1x4x32x8xf32> to vector<1x4x32x8xf32>
    %46 = vector.broadcast %45 : vector<1x4x32x8xf32> to vector<2x4x32x8xf32>
    %47 = vector.shape_cast %46 : vector<2x4x32x8xf32> to vector<8x32x8xf32>
    %c0_20 = arith.constant 0 : index
    %c0_21 = arith.constant 0 : index
    %c0_22 = arith.constant 0 : index
    %c0_23 = arith.constant 0 : index
    %48 = vector.load %arg3[%c0_20, %c0_21, %c0_22, %c0_23] : memref<3x4x1x8xf32, #tpu.memory_space<vmem>>, vector<1x4x1x8xf32>
    %49 = vector.shape_cast %48 : vector<1x4x1x8xf32> to vector<4x1x8xf32>
    %50 = vector.shape_cast %49 : vector<4x1x8xf32> to vector<1x4x1x8xf32>
    %51 = vector.shape_cast %50 : vector<1x4x1x8xf32> to vector<1x4x1x8xf32>
    %52 = vector.broadcast %51 : vector<1x4x1x8xf32> to vector<2x4x1x8xf32>
    %53 = vector.shape_cast %52 : vector<2x4x1x8xf32> to vector<8x1x8xf32>
    "tpu.trace_start"() <{level = 10 : i32, message = "btd,bdk->btk"}> : () -> ()
    %cst_24 = arith.constant dense<0.000000e+00> : vector<8x8x8xf32>
    %54 = tpu.matmul %41, %47, %cst_24 {dimension_numbers = #tpu.dot_dimension_numbers<[2], [1], [1], [2], [0, 0, 0, 1, 1, 2], [0], [0]>} : vector<8x8x32xf32>, vector<8x32x8xf32>, vector<8x8x8xf32> -> vector<8x8x8xf32>
    "tpu.trace_stop"() : () -> ()
    %55 = vector.broadcast %53 : vector<8x1x8xf32> to vector<8x8x8xf32>
    %56 = arith.addf %54, %55 : vector<8x8x8xf32>
    %c1_25 = arith.constant 1 : index
    %c0_26 = arith.constant 0 : index
    %c0_27 = arith.constant 0 : index
    %c0_28 = arith.constant 0 : index
    %57 = vector.load %arg2[%c1_25, %c0_26, %c0_27, %c0_28] : memref<3x4x32x8xf32, #tpu.memory_space<vmem>>, vector<1x4x32x8xf32>
    %58 = vector.shape_cast %57 : vector<1x4x32x8xf32> to vector<4x32x8xf32>
    %59 = vector.shape_cast %58 : vector<4x32x8xf32> to vector<1x4x32x8xf32>
    %60 = vector.shape_cast %59 : vector<1x4x32x8xf32> to vector<1x4x32x8xf32>
    %61 = vector.broadcast %60 : vector<1x4x32x8xf32> to vector<2x4x32x8xf32>
    %62 = vector.shape_cast %61 : vector<2x4x32x8xf32> to vector<8x32x8xf32>
    %c1_29 = arith.constant 1 : index
    %c0_30 = arith.constant 0 : index
    %c0_31 = arith.constant 0 : index
    %c0_32 = arith.constant 0 : index
    %63 = vector.load %arg3[%c1_29, %c0_30, %c0_31, %c0_32] : memref<3x4x1x8xf32, #tpu.memory_space<vmem>>, vector<1x4x1x8xf32>
    %64 = vector.shape_cast %63 : vector<1x4x1x8xf32> to vector<4x1x8xf32>
    %65 = vector.shape_cast %64 : vector<4x1x8xf32> to vector<1x4x1x8xf32>
    %66 = vector.shape_cast %65 : vector<1x4x1x8xf32> to vector<1x4x1x8xf32>
    %67 = vector.broadcast %66 : vector<1x4x1x8xf32> to vector<2x4x1x8xf32>
    %68 = vector.shape_cast %67 : vector<2x4x1x8xf32> to vector<8x1x8xf32>
    "tpu.trace_start"() <{level = 10 : i32, message = "btd,bdk->btk"}> : () -> ()
    %cst_33 = arith.constant dense<0.000000e+00> : vector<8x8x8xf32>
    %69 = tpu.matmul %41, %62, %cst_33 {dimension_numbers = #tpu.dot_dimension_numbers<[2], [1], [1], [2], [0, 0, 0, 1, 1, 2], [0], [0]>} : vector<8x8x32xf32>, vector<8x32x8xf32>, vector<8x8x8xf32> -> vector<8x8x8xf32>
    "tpu.trace_stop"() : () -> ()
    %70 = vector.broadcast %68 : vector<8x1x8xf32> to vector<8x8x8xf32>
    %71 = arith.addf %69, %70 : vector<8x8x8xf32>
    %c2_34 = arith.constant 2 : index
    %c0_35 = arith.constant 0 : index
    %c0_36 = arith.constant 0 : index
    %c0_37 = arith.constant 0 : index
    %72 = vector.load %arg2[%c2_34, %c0_35, %c0_36, %c0_37] : memref<3x4x32x8xf32, #tpu.memory_space<vmem>>, vector<1x4x32x8xf32>
    %73 = vector.shape_cast %72 : vector<1x4x32x8xf32> to vector<4x32x8xf32>
    %74 = vector.shape_cast %73 : vector<4x32x8xf32> to vector<1x4x32x8xf32>
    %75 = vector.shape_cast %74 : vector<1x4x32x8xf32> to vector<1x4x32x8xf32>
    %76 = vector.broadcast %75 : vector<1x4x32x8xf32> to vector<2x4x32x8xf32>
    %77 = vector.shape_cast %76 : vector<2x4x32x8xf32> to vector<8x32x8xf32>
    %c2_38 = arith.constant 2 : index
    %c0_39 = arith.constant 0 : index
    %c0_40 = arith.constant 0 : index
    %c0_41 = arith.constant 0 : index
    %78 = vector.load %arg3[%c2_38, %c0_39, %c0_40, %c0_41] : memref<3x4x1x8xf32, #tpu.memory_space<vmem>>, vector<1x4x1x8xf32>
    %79 = vector.shape_cast %78 : vector<1x4x1x8xf32> to vector<4x1x8xf32>
    %80 = vector.shape_cast %79 : vector<4x1x8xf32> to vector<1x4x1x8xf32>
    %81 = vector.shape_cast %80 : vector<1x4x1x8xf32> to vector<1x4x1x8xf32>
    %82 = vector.broadcast %81 : vector<1x4x1x8xf32> to vector<2x4x1x8xf32>
    %83 = vector.shape_cast %82 : vector<2x4x1x8xf32> to vector<8x1x8xf32>
    "tpu.trace_start"() <{level = 10 : i32, message = "btd,bdk->btk"}> : () -> ()
    %cst_42 = arith.constant dense<0.000000e+00> : vector<8x8x8xf32>
    %84 = tpu.matmul %41, %77, %cst_42 {dimension_numbers = #tpu.dot_dimension_numbers<[2], [1], [1], [2], [0, 0, 0, 1, 1, 2], [0], [0]>} : vector<8x8x32xf32>, vector<8x32x8xf32>, vector<8x8x8xf32> -> vector<8x8x8xf32>
    "tpu.trace_stop"() : () -> ()
    %85 = vector.broadcast %83 : vector<8x1x8xf32> to vector<8x8x8xf32>
    %86 = arith.addf %84, %85 : vector<8x8x8xf32>
    %87 = vector.shape_cast %1 : vector<2x8x8xf32> to vector<2x1x8x8xf32>
    %88 = vector.shape_cast %87 : vector<2x1x8x8xf32> to vector<2x1x8x8xf32>
    %89 = vector.broadcast %88 : vector<2x1x8x8xf32> to vector<2x4x8x8xf32>
    %90 = vector.shape_cast %89 : vector<2x4x8x8xf32> to vector<8x8x8xf32>
    %cst_43 = arith.constant 0.000000e+00 : f32
    %91 = vector.broadcast %cst_43 : f32 to vector<8x8x8xf32>
    %92 = arith.cmpf ogt, %90, %91 : vector<8x8x8xf32>
    %cst_44 = arith.constant 0.000000e+00 : f32
    %cst_45 = arith.constant -1.000000e+30 : f32
    %93 = vector.broadcast %cst_44 : f32 to vector<8x8x8xf32>
    %94 = vector.broadcast %cst_45 : f32 to vector<8x8x8xf32>
    %95 = arith.select %92, %93, %94 : vector<8x8x8xi1>, vector<8x8x8xf32>
    "tpu.trace_start"() <{level = 10 : i32, message = "bqd,bkd->bqk"}> : () -> ()
    %cst_46 = arith.constant dense<0.000000e+00> : vector<8x8x8xf32>
    %96 = tpu.matmul %56, %71, %cst_46 {dimension_numbers = #tpu.dot_dimension_numbers<[2], [2], [1], [1], [0, 0, 0, 1, 1, 1], [0], [0]>} : vector<8x8x8xf32>, vector<8x8x8xf32>, vector<8x8x8xf32> -> vector<8x8x8xf32>
    "tpu.trace_stop"() : () -> ()
    %cst_47 = arith.constant 0.353553385 : f32
    %97 = vector.broadcast %cst_47 : f32 to vector<8x8x8xf32>
    %98 = arith.mulf %96, %97 : vector<8x8x8xf32>
    %99 = arith.addf %98, %95 : vector<8x8x8xf32>
    %cst_48 = arith.constant dense<0xFF800000> : vector<8x8xf32>
    %100 = vector.multi_reduction <maximumf>, %99, %cst_48 [2] : vector<8x8x8xf32> to vector<8x8xf32>
    %101 = vector.shape_cast %100 : vector<8x8xf32> to vector<8x8x1xf32>
    %102 = vector.broadcast %101 : vector<8x8x1xf32> to vector<8x8x8xf32>
    %103 = arith.subf %99, %102 : vector<8x8x8xf32>
    %104 = math.exp %103 : vector<8x8x8xf32>
    %cst_49 = arith.constant dense<0.000000e+00> : vector<8x8xf32>
    %105 = vector.multi_reduction <add>, %104, %cst_49 [2] : vector<8x8x8xf32> to vector<8x8xf32>
    %106 = vector.shape_cast %105 : vector<8x8xf32> to vector<8x8x1xf32>
    %107 = tpu.reciprocal %106 {approx = true} : vector<8x8x1xf32> -> vector<8x8x1xf32>
    %108 = vector.broadcast %107 : vector<8x8x1xf32> to vector<8x8x8xf32>
    %109 = arith.mulf %104, %108 : vector<8x8x8xf32>
    %110 = arith.mulf %109, %90 : vector<8x8x8xf32>
    "tpu.trace_start"() <{level = 10 : i32, message = "bqk,bkd->bqd"}> : () -> ()
    %cst_50 = arith.constant dense<0.000000e+00> : vector<8x8x8xf32>
    %111 = tpu.matmul %110, %86, %cst_50 {dimension_numbers = #tpu.dot_dimension_numbers<[2], [1], [1], [2], [0, 0, 0, 1, 1, 2], [0], [0]>} : vector<8x8x8xf32>, vector<8x8x8xf32>, vector<8x8x8xf32> -> vector<8x8x8xf32>
    "tpu.trace_stop"() : () -> ()
    %c0_51 = arith.constant 0 : index
    %c0_52 = arith.constant 0 : index
    %c0_53 = arith.constant 0 : index
    %112 = vector.load %arg4[%c0_51, %c0_52, %c0_53] : memref<4x8x32xf32, #tpu.memory_space<vmem>>, vector<4x8x32xf32>
    %113 = vector.shape_cast %112 : vector<4x8x32xf32> to vector<1x4x8x32xf32>
    %114 = vector.shape_cast %113 : vector<1x4x8x32xf32> to vector<1x4x8x32xf32>
    %115 = vector.broadcast %114 : vector<1x4x8x32xf32> to vector<2x4x8x32xf32>
    %116 = vector.shape_cast %115 : vector<2x4x8x32xf32> to vector<8x8x32xf32>
    "tpu.trace_start"() <{level = 10 : i32, message = "btk,bkd->btd"}> : () -> ()
    %cst_54 = arith.constant dense<0.000000e+00> : vector<8x8x32xf32>
    %117 = tpu.matmul %111, %116, %cst_54 {dimension_numbers = #tpu.dot_dimension_numbers<[2], [1], [1], [2], [0, 0, 0, 1, 1, 2], [0], [0]>} : vector<8x8x8xf32>, vector<8x8x32xf32>, vector<8x8x32xf32> -> vector<8x8x32xf32>
    "tpu.trace_stop"() : () -> ()
    %118 = vector.shape_cast %117 : vector<8x8x32xf32> to vector<2x4x8x32xf32>
    %cst_55 = arith.constant dense<0.000000e+00> : vector<2x8x32xf32>
    %119 = vector.multi_reduction <add>, %118, %cst_55 [1] : vector<2x4x8x32xf32> to vector<2x8x32xf32>
    %120 = vector.shape_cast %7 : vector<32xf32> to vector<1x1x32xf32>
    %121 = vector.broadcast %120 : vector<1x1x32xf32> to vector<2x8x32xf32>
    %122 = arith.addf %119, %121 : vector<2x8x32xf32>
    %123 = arith.addf %0, %122 : vector<2x8x32xf32>
    %cst_56 = arith.constant dense<0.000000e+00> : vector<2x8xf32>
    %124 = vector.multi_reduction <add>, %123, %cst_56 [2] : vector<2x8x32xf32> to vector<2x8xf32>
    %125 = vector.shape_cast %124 : vector<2x8xf32> to vector<2x8x1xf32>
    %cst_57 = arith.constant 3.200000e+01 : f32
    %126 = vector.broadcast %cst_57 : f32 to vector<2x8x1xf32>
    %127 = arith.divf %125, %126 : vector<2x8x1xf32>
    %128 = vector.broadcast %127 : vector<2x8x1xf32> to vector<2x8x32xf32>
    %129 = arith.subf %123, %128 : vector<2x8x32xf32>
    %130 = arith.mulf %129, %129 : vector<2x8x32xf32>
    %cst_58 = arith.constant dense<0.000000e+00> : vector<2x8xf32>
    %131 = vector.multi_reduction <add>, %130, %cst_58 [2] : vector<2x8x32xf32> to vector<2x8xf32>
    %132 = vector.shape_cast %131 : vector<2x8xf32> to vector<2x8x1xf32>
    %cst_59 = arith.constant 3.200000e+01 : f32
    %133 = vector.broadcast %cst_59 : f32 to vector<2x8x1xf32>
    %134 = arith.divf %132, %133 : vector<2x8x1xf32>
    %135 = vector.broadcast %127 : vector<2x8x1xf32> to vector<2x8x32xf32>
    %136 = arith.subf %123, %135 : vector<2x8x32xf32>
    %cst_60 = arith.constant 9.99999974E-6 : f32
    %137 = vector.broadcast %cst_60 : f32 to vector<2x8x1xf32>
    %138 = arith.addf %134, %137 : vector<2x8x1xf32>
    %139 = math.rsqrt %138 : vector<2x8x1xf32>
    %140 = vector.broadcast %139 : vector<2x8x1xf32> to vector<2x8x32xf32>
    %141 = arith.mulf %136, %140 : vector<2x8x32xf32>
    %142 = vector.shape_cast %9 : vector<32xf32> to vector<1x1x32xf32>
    %143 = vector.broadcast %142 : vector<1x1x32xf32> to vector<2x8x32xf32>
    %144 = arith.mulf %141, %143 : vector<2x8x32xf32>
    %145 = vector.shape_cast %11 : vector<32xf32> to vector<1x1x32xf32>
    %146 = vector.broadcast %145 : vector<1x1x32xf32> to vector<2x8x32xf32>
    %147 = arith.addf %144, %146 : vector<2x8x32xf32>
    %c0_61 = arith.constant 0 : index
    %c0_62 = arith.constant 0 : index
    %148 = vector.load %arg6[%c0_61, %c0_62] : memref<32x64xf32, #tpu.memory_space<vmem>>, vector<32x64xf32>
    %149 = vector.shape_cast %148 : vector<32x64xf32> to vector<1x32x64xf32>
    %150 = vector.shape_cast %149 : vector<1x32x64xf32> to vector<1x32x64xf32>
    %151 = vector.broadcast %150 : vector<1x32x64xf32> to vector<2x32x64xf32>
    %c0_63 = arith.constant 0 : index
    %c0_64 = arith.constant 0 : index
    %152 = vector.load %arg8[%c0_63, %c0_64] : memref<64x32xf32, #tpu.memory_space<vmem>>, vector<64x32xf32>
    %153 = vector.shape_cast %152 : vector<64x32xf32> to vector<1x64x32xf32>
    %154 = vector.shape_cast %153 : vector<1x64x32xf32> to vector<1x64x32xf32>
    %155 = vector.broadcast %154 : vector<1x64x32xf32> to vector<2x64x32xf32>
    "tpu.trace_start"() <{level = 10 : i32, message = "btd,bdf->btf"}> : () -> ()
    %cst_65 = arith.constant dense<0.000000e+00> : vector<2x8x64xf32>
    %156 = tpu.matmul %147, %151, %cst_65 {dimension_numbers = #tpu.dot_dimension_numbers<[2], [1], [1], [2], [0, 0, 0, 1, 1, 2], [0], [0]>} : vector<2x8x32xf32>, vector<2x32x64xf32>, vector<2x8x64xf32> -> vector<2x8x64xf32>
    "tpu.trace_stop"() : () -> ()
    %c0_66 = arith.constant 0 : index
    %c0_67 = arith.constant 0 : index
    %157 = vector.load %arg7[%c0_66, %c0_67] : memref<1x64xf32, #tpu.memory_space<vmem>>, vector<1x64xf32>
    %158 = vector.shape_cast %157 : vector<1x64xf32> to vector<1x1x64xf32>
    %159 = vector.broadcast %158 : vector<1x1x64xf32> to vector<2x8x64xf32>
    %160 = arith.addf %156, %159 : vector<2x8x64xf32>
    %cst_68 = arith.constant 0.000000e+00 : f32
    %161 = vector.broadcast %cst_68 : f32 to vector<2x8x64xf32>
    %162 = arith.maximumf %160, %161 : vector<2x8x64xf32>
    "tpu.trace_start"() <{level = 10 : i32, message = "btf,bfd->btd"}> : () -> ()
    %cst_69 = arith.constant dense<0.000000e+00> : vector<2x8x32xf32>
    %163 = tpu.matmul %162, %155, %cst_69 {dimension_numbers = #tpu.dot_dimension_numbers<[2], [1], [1], [2], [0, 0, 0, 1, 1, 2], [0], [0]>} : vector<2x8x64xf32>, vector<2x64x32xf32>, vector<2x8x32xf32> -> vector<2x8x32xf32>
    "tpu.trace_stop"() : () -> ()
    %164 = vector.shape_cast %13 : vector<32xf32> to vector<1x1x32xf32>
    %165 = vector.broadcast %164 : vector<1x1x32xf32> to vector<2x8x32xf32>
    %166 = arith.addf %163, %165 : vector<2x8x32xf32>
    %167 = arith.addf %123, %166 : vector<2x8x32xf32>
    %c0_70 = arith.constant 0 : index
    %c0_71 = arith.constant 0 : index
    %c0_72 = arith.constant 0 : index
    %168 = vector.load %arg9[%c0_70, %c0_71, %c0_72] : memref<2x8x32xf32, #tpu.memory_space<vmem>>, vector<2x8x32xf32>
    tpu.vector_store %arg9[%c0_70, %c0_71, %c0_72], %167 {strides = array<i32>} : memref<2x8x32xf32, #tpu.memory_space<vmem>>, vector<2x8x32xf32>,
    return
  }
}

</mosaic_0001>

<bundles_post_ra>
// kernel: tpu_custom_call.1
= control target key start
LH: loop header
LB: loop body
LE: loop exit
PB: predicated region body
PF: predicated region fallthrough
CT: control target
= control target key end

     0   :  { %vm43_vm0 = vcmask 261120   ;;  %s5921_s0 = inlined_call_operand.vmem [shape: f32[2,8,32], index: 0, kind: input, shape index: {}]   ;;  %s5922_s1 = inlined_call_operand.vmem [shape: f32[2,8,8], index: 1, kind: input, shape index: {}]   ;;  %s5923_s2 = inlined_call_operand.vmem [shape: f32[3,4,32,8], index: 2, kind: input, shape index: {}]   ;;  %s5924_s3 = inlined_call_operand.vmem [shape: f32[3,4,1,8], index: 3, kind: input, shape index: {}]   ;;  %s5925_s4 = inlined_call_operand.vmem [shape: f32[4,8,32], index: 4, kind: input, shape index: {}]   ;;  %s5926_s5 = inlined_call_operand.vmem [shape: f32[6,32], index: 5, kind: input, shape index: {}]   ;;  %s5927_s6 = inlined_call_operand.vmem [shape: f32[32,64], index: 6, kind: input, shape index: {}]   ;;  %s5928_s7 = inlined_call_operand.vmem [shape: f32[1,64], index: 7, kind: input, shape index: {}]   ;;  %s5929_s8 = inlined_call_operand.vmem [shape: f32[64,32], index: 8, kind: input, shape index: {}]   ;;  %s5930_s9 = inlined_call_operand.hbm [shape: f32[2,8,32], index: 9, kind: output, shape index: {}]  }
   0x1   :  { %v33_v0 = vld [vmem:[%s5921_s0] sm:$0xff]  ;;  %v34_v1 = vld [vmem:[%s5921_s0 + $0x8] sm:$0xff] }
   0x2   :  { %14 = vsyncpa [#allocation3], 0  ;;  %v44_v2 = vsel %vm43_vm0, %v33_v0, 0.0  ;;  %v47_v3 = vsel %vm43_vm0, %v34_v1, 0.0  ;;  %v83_v14 = vld [vmem:[%s5923_s2] sm:$0xff]  ;;  %v84_v15 = vld [vmem:[%s5923_s2 + $0x8] sm:$0xff] }
   0x3   :  { %45 = vadd.xlane.f32.xlu0 %v44_v2  ;;  %v87_v16 = vld [vmem:[%s5923_s2 + $0x20] sm:$0xff]  ;;  %v5292_v17 = vpack.c.bf16 %v84_v15, %v83_v14  ;;  %v88_v18 = vld [vmem:[%s5923_s2 + $0x28] sm:$0xff]  ;;  %v5212_v19 = vmov 0.0|0.0   ;;  %v85_v21 = vld [vmem:[%s5923_s2 + $0x10] sm:$0xff]  ;;  %vm5213_vm1 = vmmov 0   ;;  %v5214_v27 = vmov 0.0  }
   0x4   :  { %4959 = vmatprep.subr.bf16.mxu0 %v5212_v19  ;;  %4965 = vmatprep.subr.bf16.mxu1 %v5212_v19  ;;  %v4966_v20 = vpack.c.bf16 %v88_v18, %v87_v16  ;;  %v86_v22 = vld [vmem:[%s5923_s2 + $0x18] sm:$0xff]  ;;  %v89_v23 = vld [vmem:[%s5923_s2 + $0x30] sm:$0xff]  ;;  %v4200_v35 = vld [vmem:[%s5926_s5] ss:$0 sm:$0xff]  ;;  %vm1909_vm2 = vcmask 64512   ;;  %vm4033_vm5 = vcmask 523264  }
   0x5   :  { %4961 = vmatpush3.bf16.msra.mxu0 %v5292_v17  ;;  %v4963_v24 = vpack.c.bf16 %v86_v22, %v85_v21  ;;  %v90_v25 = vld [vmem:[%s5923_s2 + $0x38] sm:$0xff]  ;;  %4523 = vmatprep.mubr.msk.f32.mxu0 %vm5213_vm1, %v5214_v27  ;;  %v91_v36 = vld [vmem:[%s5923_s2 + $0x40] sm:$0xff]  ;;  %v92_v38 = vld [vmem:[%s5923_s2 + $0x48] sm:$0xff] }
   0x6   :  { %4967 = vmatpush3.bf16.msra.mxu1 %v4966_v20  ;;  %4962 = vmatprep.subr.bf16.mxu0 %v5212_v19  ;;  %v4969_v26 = vpack.c.bf16 %v90_v25, %v89_v23  ;;  %v95_v39 = vld [vmem:[%s5923_s2 + $0x60] sm:$0xff]  ;;  %v96_v40 = vld [vmem:[%s5923_s2 + $0x68] sm:$0xff]  ;;  %v4972_v43 = vpack.c.bf16 %v92_v38, %v91_v36  ;;  %v93_v45 = vld [vmem:[%s5923_s2 + $0x50] sm:$0xff] }
   0x7   :  { %48 = vadd.xlane.f32.xlu0 %v47_v3  ;;  %4968 = vmatprep.subr.bf16.mxu1 %v5212_v19  ;;  %v4201_v41 = vld [vmem:[%s5926_s5 + $0x1] ss:$0 sm:$0xff]  ;;  %v4978_v44 = vpack.c.bf16 %v96_v40, %v95_v39  ;;  %v94_v47 = vld [vmem:[%s5923_s2 + $0x58] sm:$0xff]  ;;  %v97_v48 = vld [vmem:[%s5923_s2 + $0x70] sm:$0xff] }
   0x8   :  { %4534 = vmatprep.mubr.msk.f32.mxu1 %vm5213_vm1, %v5214_v27  ;;  %v98_v49 = vld [vmem:[%s5923_s2 + $0x78] sm:$0xff]  ;;  %v4975_v50 = vpack.c.bf16 %v94_v47, %v93_v45  ;;  %v4214_v56 = vld [vmem:[%s5923_s2 + $0x80] sm:$0xff]  ;;  %v4215_v57 = vld [vmem:[%s5923_s2 + $0x88] sm:$0xff] }
   0x9   :  { %4964 = vmatpush3.bf16.msra.mxu0 %v4963_v24  ;;  %v4981_v51 = vpack.c.bf16 %v98_v49, %v97_v48  ;;  %v4218_v58 = vld [vmem:[%s5923_s2 + $0xa0] sm:$0xff]  ;;  %v4219_v59 = vld [vmem:[%s5923_s2 + $0xa8] sm:$0xff]  ;;  %v5008_v60 = vpack.c.bf16 %v4215_v57, %v4214_v56  ;;  %v4216_v62 = vld [vmem:[%s5923_s2 + $0x90] sm:$0xff] }
   0xa   :  { %4970 = vmatpush3.bf16.msra.mxu1 %v4969_v26  ;;  %4971 = vmatprep.subr.bf16.mxu0 %v5212_v19  ;;  %v5014_v61 = vpack.c.bf16 %v4219_v59, %v4218_v58  ;;  %v4217_v63 = vld [vmem:[%s5923_s2 + $0x98] sm:$0xff]  ;;  %v4246_v16 = vld [vmem:[%s5923_s2 + $0x100] sm:$0xff]  ;;  %v4248_v23 = vld [vmem:[%s5923_s2 + $0x110] sm:$0xff] }
   0xb   :  { %4977 = vmatprep.subr.bf16.mxu1 %v5212_v19  ;;  %v5011_v2 = vpack.c.bf16 %v4217_v63, %v4216_v62  ;;  %v4250_v18 = vld [vmem:[%s5923_s2 + $0x120] sm:$0xff]  ;;  %v4252_v25 = vld [vmem:[%s5923_s2 + $0x130] sm:$0xff]  ;;  %v4261_v39 = vld [vmem:[%s5923_s2 + $0x178] sm:$0xff] }
   0xc   :  { %v4256_v36 = vld [vmem:[%s5923_s2 + $0x150] sm:$0xff]  ;;  %v4234_v58 = vld [vmem:[%s5924_s3 + $0x4] ss:$0 sm:$0xff]  ;;  %v4235_v59 = vld [vmem:[%s5924_s3 + $0x5] ss:$0 sm:$0xff] }
   0xd   :  { %v4260_v38 = vld [vmem:[%s5923_s2 + $0x170] sm:$0xff]  ;;  %v4202_v62 = vld [vmem:[%s5924_s3] ss:$0 sm:$0xff]  ;;  %v4203_v63 = vld [vmem:[%s5924_s3 + $0x1] ss:$0 sm:$0xff] }
  0x90   :  { %v46_v4 = vpop.xlane.xlu0 %45 }
  0x91   :  { %v51_v5 = vmul.f32 0.03125, %v46_v4  ;;  %v4222_v4 = vld [vmem:[%s5923_s2 + $0xc0] sm:$0xff] }
  0x93   :  { %v53_v6 = vsub.f32 %v33_v0, %v51_v5  ;;  %v4220_v0 = vld [vmem:[%s5923_s2 + $0xb0] sm:$0xff]  ;;  %v4223_v5 = vld [vmem:[%s5923_s2 + $0xc8] sm:$0xff] }
  0x94   :  { %v49_v7 = vpop.xlane.xlu0 %48 }
  0x95   :  { %v52_v8 = vmul.f32 0.03125, %v49_v7  ;;  %v55_v9 = vmul.f32 %v53_v6, %v53_v6  ;;  %v4227_v7 = vld [vmem:[%s5923_s2 + $0xe8] sm:$0xff] }
  0x97   :  { %v5277_v10 = vsub.f32 %v34_v1, %v52_v8  ;;  %v57_v11 = vsel %vm43_vm0, %v55_v9, 0.0  ;;  %v4221_v1 = vld [vmem:[%s5923_s2 + $0xb8] sm:$0xff]  ;;  %v5020_v8 = vpack.c.bf16 %v4223_v5, %v4222_v4 }
  0x98   :  { %58 = vadd.xlane.f32.xlu1 %v57_v11  ;;  %v5017_v3 = vpack.c.bf16 %v4221_v1, %v4220_v0  ;;  %v4225_v11 = vld [vmem:[%s5923_s2 + $0xd8] sm:$0xff] }
  0x99   :  { %v56_v12 = vmul.f32 %v5277_v10, %v5277_v10 }
  0x9b   :  { %v60_v13 = vsel %vm43_vm0, %v56_v12, 0.0  ;;  %v4228_v12 = vld [vmem:[%s5923_s2 + $0xf0] sm:$0xff] }
  0x9c   :  { %61 = vadd.xlane.f32.xlu1 %v60_v13  ;;  %v4229_v13 = vld [vmem:[%s5923_s2 + $0xf8] sm:$0xff] }
  0x9d   :  { %v5029_v15 = vpack.c.bf16 %v4229_v13, %v4228_v12 }
 0x125   :  { %v59_v28 = vpop.xlane.xlu1 %58 }
 0x126   :  { %v63_v29 = vmul.f32 0.03125, %v59_v28 }
 0x128   :  { %v65_v30 = vadd.f32 1e-05, %v63_v29 }
 0x129   :  { %v62_v31 = vpop.xlane.xlu1 %61 }
 0x12a   :  { %5146 = vrsqrt.f32 %v65_v30  ;;  %v64_v32 = vmul.f32 0.03125, %v62_v31  ;;  %v4254_v30 = vld [vmem:[%s5923_s2 + $0x140] sm:$0xff]  ;;  %v4255_v31 = vld [vmem:[%s5923_s2 + $0x148] sm:$0xff] }
 0x12c   :  { %v66_v33 = vadd.f32 1e-05, %v64_v32  ;;  %v4258_v32 = vld [vmem:[%s5923_s2 + $0x160] sm:$0xff] }
 0x12e   :  { %5148 = vrsqrt.f32 %v66_v33  ;;  %v4259_v33 = vld [vmem:[%s5923_s2 + $0x168] sm:$0xff] }
 0x134   :  { %v5147_v34 = vpop.eup %5146 }
 0x135   :  { %v69_v37 = vmul.f32 %v5147_v34, %v53_v6  ;;  %v4226_v6 = vld [vmem:[%s5923_s2 + $0xe0] sm:$0xff]  ;;  %v5068_v34 = vpack.c.bf16 %v4255_v31, %v4254_v30 }
 0x136   :  { %v5026_v9 = vpack.c.bf16 %v4227_v7, %v4226_v6  ;;  %v4236_v6 = vld [vmem:[%s5924_s3 + $0x6] ss:$0 sm:$0xff]  ;;  %v4237_v7 = vld [vmem:[%s5924_s3 + $0x7] ss:$0 sm:$0xff] }
 0x137   :  { %v75_v42 = vmul.f32 %v4200_v35, %v69_v37  ;;  %v4257_v37 = vld [vmem:[%s5923_s2 + $0x158] sm:$0xff] }
 0x138   :  { %v5149_v52 = vpop.eup %5148  ;;  %v5071_v40 = vpack.c.bf16 %v4257_v37, %v4256_v36  ;;  %v4266_v36 = vld [vmem:[%s5924_s3 + $0x8] ss:$0 sm:$0xff]  ;;  %v4267_v37 = vld [vmem:[%s5924_s3 + $0x9] ss:$0 sm:$0xff] }
 0x139   :  { %v5341_v46 = vadd.f32 %v4201_v41, %v75_v42  ;;  %v70_v53 = vmul.f32 %v5149_v52, %v5277_v10  ;;  %v4224_v10 = vld [vmem:[%s5923_s2 + $0xd0] sm:$0xff] }
 0x13a   :  { %v5023_v14 = vpack.c.bf16 %v4225_v11, %v4224_v10  ;;  %v4204_v10 = vld [vmem:[%s5924_s3 + $0x2] ss:$0 sm:$0xff]  ;;  %v4205_v11 = vld [vmem:[%s5924_s3 + $0x3] ss:$0 sm:$0xff] }
 0x13b   :  { %4524 = vmatmul.mubr.msk.f32.vlgmr.msra.gmra.mrb[0].mxu0 %vm43_vm0, %v5341_v46  ;;  %4535 = vmatmul.mubr.msk.f32.vlgmr.msra.gmra.mrb[0].mxu1 %vm43_vm0, %v5341_v46  ;;  %v76_v54 = vmul.f32 %v4200_v35, %v70_v53  ;;  %v5074_v35 = vpack.c.bf16 %v4259_v33, %v4258_v32 }
 0x13c   :  { %4973 = vmatpush3.bf16.msra.mxu0 %v4972_v43  ;;  %4979 = vmatpush3.bf16.msra.mxu1 %v4978_v44 }
 0x13d   :  { %4974 = vmatprep.subr.bf16.mxu0 %v5212_v19  ;;  %4980 = vmatprep.subr.bf16.mxu1 %v5212_v19  ;;  %v5376_v55 = vadd.f32 %v4201_v41, %v76_v54  ;;  %v5077_v41 = vpack.c.bf16 %v4261_v39, %v4260_v38 }
 0x13e   :  { %4545 = vmatprep.mubr.msk.f32.mxu0 %vm5213_vm1, %v5214_v27  ;;  %4556 = vmatprep.mubr.msk.f32.mxu1 %vm5213_vm1, %v5214_v27 }
 0x140   :  { %4976 = vmatpush3.bf16.msra.mxu0 %v4975_v50  ;;  %4982 = vmatpush3.bf16.msra.mxu1 %v4981_v51 }
 0x141   :  { %4983 = vmatprep.subr.bf16.mxu0 %v5212_v19  ;;  %4989 = vmatprep.subr.bf16.mxu1 %v5212_v19 }
 0x143   :  { %4546 = vmatmul.mubr.msk.f32.vlgmr.msra.gmra.mrb[2].mxu0 %vm43_vm0, %v5341_v46  ;;  %4557 = vmatmul.mubr.msk.f32.vlgmr.msra.gmra.mrb[2].mxu1 %vm43_vm0, %v5341_v46 }
 0x144   :  { %4985 = vmatpush3.bf16.msra.mxu0 %v5292_v17  ;;  %4991 = vmatpush3.bf16.msra.mxu1 %v4966_v20  ;;  %v4247_v17 = vld [vmem:[%s5923_s2 + $0x108] sm:$0xff] }
 0x145   :  { %4986 = vmatprep.subr.bf16.mxu0 %v5212_v19  ;;  %4992 = vmatprep.subr.bf16.mxu1 %v5212_v19  ;;  %v4251_v20 = vld [vmem:[%s5923_s2 + $0x128] sm:$0xff]  ;;  %v5056_v21 = vpack.c.bf16 %v4247_v17, %v4246_v16 }
 0x146   :  { %4567 = vmatprep.mubr.msk.f32.mxu0 %vm5213_vm1, %v5214_v27  ;;  %4578 = vmatprep.mubr.msk.f32.mxu1 %vm5213_vm1, %v5214_v27  ;;  %v5062_v22 = vpack.c.bf16 %v4251_v20, %v4250_v18 }
 0x148   :  { %4988 = vmatpush3.bf16.msra.mxu0 %v4963_v24  ;;  %4994 = vmatpush3.bf16.msra.mxu1 %v4969_v26  ;;  %v4249_v24 = vld [vmem:[%s5923_s2 + $0x118] sm:$0xff] }
 0x149   :  { %4995 = vmatprep.subr.bf16.mxu0 %v5212_v19  ;;  %5001 = vmatprep.subr.bf16.mxu1 %v5212_v19  ;;  %v4253_v26 = vld [vmem:[%s5923_s2 + $0x138] sm:$0xff]  ;;  %v5059_v28 = vpack.c.bf16 %v4249_v24, %v4248_v23 }
 0x14a   :  { %v5065_v29 = vpack.c.bf16 %v4253_v26, %v4252_v25 }
 0x14b   :  { %4568 = vmatmul.mubr.msk.f32.vlgmr.msra.gmra.mrb[4].mxu0 %vm43_vm0, %v5376_v55  ;;  %4579 = vmatmul.mubr.msk.f32.vlgmr.msra.gmra.mrb[4].mxu1 %vm43_vm0, %v5376_v55 }
 0x14c   :  { %4997 = vmatpush3.bf16.msra.mxu0 %v4972_v43  ;;  %5003 = vmatpush3.bf16.msra.mxu1 %v4978_v44 }
 0x14d   :  { %4998 = vmatprep.subr.bf16.mxu0 %v5212_v19  ;;  %5004 = vmatprep.subr.bf16.mxu1 %v5212_v19 }
 0x14e   :  { %4589 = vmatprep.mubr.msk.f32.mxu0 %vm5213_vm1, %v5214_v27  ;;  %4600 = vmatprep.mubr.msk.f32.mxu1 %vm5213_vm1, %v5214_v27 }
 0x150   :  { %5000 = vmatpush3.bf16.msra.mxu0 %v4975_v50  ;;  %5006 = vmatpush3.bf16.msra.mxu1 %v4981_v51 }
 0x151   :  { %5007 = vmatprep.subr.bf16.mxu0 %v5212_v19  ;;  %5013 = vmatprep.subr.bf16.mxu1 %v5212_v19 }
 0x153   :  { %4590 = vmatmul.mubr.msk.f32.vlgmr.msra.gmra.mrb[6].mxu0 %vm43_vm0, %v5376_v55  ;;  %4601 = vmatmul.mubr.msk.f32.vlgmr.msra.gmra.mrb[6].mxu1 %vm43_vm0, %v5376_v55 }
 0x154   :  { %5009 = vmatpush3.bf16.msra.mxu0 %v5008_v60  ;;  %5015 = vmatpush3.bf16.msra.mxu1 %v5014_v61 }
 0x155   :  { %5010 = vmatprep.subr.bf16.mxu0 %v5212_v19  ;;  %5016 = vmatprep.subr.bf16.mxu1 %v5212_v19 }
 0x156   :  { %4611 = vmatprep.mubr.msk.f32.mxu0 %vm5213_vm1, %v5214_v27  ;;  %4622 = vmatprep.mubr.msk.f32.mxu1 %vm5213_vm1, %v5214_v27 }
 0x158   :  { %5012 = vmatpush3.bf16.msra.mxu0 %v5011_v2  ;;  %5018 = vmatpush3.bf16.msra.mxu1 %v5017_v3 }
 0x159   :  { %5019 = vmatprep.subr.bf16.mxu0 %v5212_v19  ;;  %5025 = vmatprep.subr.bf16.mxu1 %v5212_v19 }
 0x15b   :  { %4612 = vmatmul.mubr.msk.f32.vlgmr.msra.gmra.mrb[8].mxu0 %vm43_vm0, %v5341_v46  ;;  %4623 = vmatmul.mubr.msk.f32.vlgmr.msra.gmra.mrb[8].mxu1 %vm43_vm0, %v5341_v46 }
 0x15c   :  { %5021 = vmatpush3.bf16.msra.mxu0 %v5020_v8  ;;  %5027 = vmatpush3.bf16.msra.mxu1 %v5026_v9 }
 0x15d   :  { %5022 = vmatprep.subr.bf16.mxu0 %v5212_v19  ;;  %5028 = vmatprep.subr.bf16.mxu1 %v5212_v19 }
 0x15e   :  { %4633 = vmatprep.mubr.msk.f32.mxu0 %vm5213_vm1, %v5214_v27  ;;  %4644 = vmatprep.mubr.msk.f32.mxu1 %vm5213_vm1, %v5214_v27 }
 0x160   :  { %5024 = vmatpush3.bf16.msra.mxu0 %v5023_v14  ;;  %5030 = vmatpush3.bf16.msra.mxu1 %v5029_v15 }
 0x161   :  { %5031 = vmatprep.subr.bf16.mxu0 %v5212_v19  ;;  %5037 = vmatprep.subr.bf16.mxu1 %v5212_v19 }
 0x163   :  { %4634 = vmatmul.mubr.msk.f32.vlgmr.msra.gmra.mrb[10].mxu0 %vm43_vm0, %v5341_v46  ;;  %4645 = vmatmul.mubr.msk.f32.vlgmr.msra.gmra.mrb[10].mxu1 %vm43_vm0, %v5341_v46 }
 0x164   :  { %5033 = vmatpush3.bf16.msra.mxu0 %v5008_v60  ;;  %5039 = vmatpush3.bf16.msra.mxu1 %v5014_v61 }
 0x165   :  { %5034 = vmatprep.subr.bf16.mxu0 %v5212_v19  ;;  %5040 = vmatprep.subr.bf16.mxu1 %v5212_v19 }
 0x166   :  { %4655 = vmatprep.mubr.msk.f32.mxu0 %vm5213_vm1, %v5214_v27  ;;  %4666 = vmatprep.mubr.msk.f32.mxu1 %vm5213_vm1, %v5214_v27 }
 0x168   :  { %5036 = vmatpush3.bf16.msra.mxu0 %v5011_v2  ;;  %5042 = vmatpush3.bf16.msra.mxu1 %v5017_v3 }
 0x169   :  { %5043 = vmatprep.subr.bf16.mxu0 %v5212_v19  ;;  %5049 = vmatprep.subr.bf16.mxu1 %v5212_v19 }
 0x16b   :  { %4656 = vmatmul.mubr.msk.f32.vlgmr.msra.gmra.mrb[12].mxu0 %vm43_vm0, %v5376_v55  ;;  %4667 = vmatmul.mubr.msk.f32.vlgmr.msra.gmra.mrb[12].mxu1 %vm43_vm0, %v5376_v55 }
 0x16c   :  { %5045 = vmatpush3.bf16.msra.mxu0 %v5020_v8  ;;  %5051 = vmatpush3.bf16.msra.mxu1 %v5026_v9 }
 0x16d   :  { %5046 = vmatprep.subr.bf16.mxu0 %v5212_v19  ;;  %5052 = vmatprep.subr.bf16.mxu1 %v5212_v19 }
 0x16e   :  { %4677 = vmatprep.mubr.msk.f32.mxu0 %vm5213_vm1, %v5214_v27  ;;  %4688 = vmatprep.mubr.msk.f32.mxu1 %vm5213_vm1, %v5214_v27 }
 0x170   :  { %5048 = vmatpush3.bf16.msra.mxu0 %v5023_v14  ;;  %5054 = vmatpush3.bf16.msra.mxu1 %v5029_v15 }
 0x171   :  { %5055 = vmatprep.subr.bf16.mxu0 %v5212_v19  ;;  %5061 = vmatprep.subr.bf16.mxu1 %v5212_v19 }
 0x173   :  { %4678 = vmatmul.mubr.msk.f32.vlgmr.msra.gmra.mrb[14].mxu0 %vm43_vm0, %v5376_v55  ;;  %4689 = vmatmul.mubr.msk.f32.vlgmr.msra.gmra.mrb[14].mxu1 %vm43_vm0, %v5376_v55 }
 0x174   :  { %5057 = vmatpush3.bf16.msra.mxu0 %v5056_v21  ;;  %5063 = vmatpush3.bf16.msra.mxu1 %v5062_v22 }
 0x175   :  { %5058 = vmatprep.subr.bf16.mxu0 %v5212_v19  ;;  %5064 = vmatprep.subr.bf16.mxu1 %v5212_v19 }
 0x176   :  { %4699 = vmatprep.mubr.msk.f32.mxu0 %vm5213_vm1, %v5214_v27  ;;  %4710 = vmatprep.mubr.msk.f32.mxu1 %vm5213_vm1, %v5214_v27 }
 0x178   :  { %5060 = vmatpush3.bf16.msra.mxu0 %v5059_v28  ;;  %5066 = vmatpush3.bf16.msra.mxu1 %v5065_v29 }
 0x179   :  { %5067 = vmatprep.subr.bf16.mxu0 %v5212_v19  ;;  %5073 = vmatprep.subr.bf16.mxu1 %v5212_v19 }
 0x17b   :  { %4700 = vmatmul.mubr.msk.f32.vlgmr.msra.gmra.mrb[16].mxu0 %vm43_vm0, %v5341_v46  ;;  %4711 = vmatmul.mubr.msk.f32.vlgmr.msra.gmra.mrb[16].mxu1 %vm43_vm0, %v5341_v46 }
 0x17c   :  { %5069 = vmatpush3.bf16.msra.mxu0 %v5068_v34  ;;  %5075 = vmatpush3.bf16.msra.mxu1 %v5074_v35 }
 0x17d   :  { %5070 = vmatprep.subr.bf16.mxu0 %v5212_v19  ;;  %5076 = vmatprep.subr.bf16.mxu1 %v5212_v19 }
 0x17e   :  { %4721 = vmatprep.mubr.msk.f32.mxu0 %vm5213_vm1, %v5214_v27  ;;  %4732 = vmatprep.mubr.msk.f32.mxu1 %vm5213_vm1, %v5214_v27 }
 0x180   :  { %5072 = vmatpush3.bf16.msra.mxu0 %v5071_v40  ;;  %5078 = vmatpush3.bf16.msra.mxu1 %v5077_v41 }
 0x181   :  { %5079 = vmatprep.subr.bf16.mxu0 %v5212_v19  ;;  %5085 = vmatprep.subr.bf16.mxu1 %v5212_v19 }
 0x183   :  { %4722 = vmatmul.mubr.msk.f32.vlgmr.msra.gmra.mrb[18].mxu0 %vm43_vm0, %v5341_v46  ;;  %4733 = vmatmul.mubr.msk.f32.vlgmr.msra.gmra.mrb[18].mxu1 %vm43_vm0, %v5341_v46 }
 0x184   :  { %5081 = vmatpush3.bf16.msra.mxu0 %v5056_v21  ;;  %5087 = vmatpush3.bf16.msra.mxu1 %v5062_v22 }
 0x185   :  { %5082 = vmatprep.subr.bf16.mxu0 %v5212_v19  ;;  %5088 = vmatprep.subr.bf16.mxu1 %v5212_v19 }
 0x186   :  { %4743 = vmatprep.mubr.msk.f32.mxu0 %vm5213_vm1, %v5214_v27  ;;  %4754 = vmatprep.mubr.msk.f32.mxu1 %vm5213_vm1, %v5214_v27 }
 0x188   :  { %5084 = vmatpush3.bf16.msra.mxu0 %v5059_v28  ;;  %5090 = vmatpush3.bf16.msra.mxu1 %v5065_v29 }
 0x189   :  { %5091 = vmatprep.subr.bf16.mxu0 %v5212_v19  ;;  %5097 = vmatprep.subr.bf16.mxu1 %v5212_v19 }
 0x18b   :  { %4744 = vmatmul.mubr.msk.f32.vlgmr.msra.gmra.mrb[20].mxu0 %vm43_vm0, %v5376_v55  ;;  %4755 = vmatmul.mubr.msk.f32.vlgmr.msra.gmra.mrb[20].mxu1 %vm43_vm0, %v5376_v55 }
 0x18c   :  { %5093 = vmatpush3.bf16.msra.mxu0 %v5068_v34  ;;  %5099 = vmatpush3.bf16.msra.mxu1 %v5074_v35 }
 0x18d   :  { %5094 = vmatprep.subr.bf16.mxu0 %v5212_v19  ;;  %5100 = vmatprep.subr.bf16.mxu1 %v5212_v19 }
 0x18e   :  { %4765 = vmatprep.mubr.msk.f32.mxu0 %vm5213_vm1, %v5214_v27  ;;  %4776 = vmatprep.mubr.msk.f32.mxu1 %vm5213_vm1, %v5214_v27 }
 0x190   :  { %5096 = vmatpush3.bf16.msra.mxu0 %v5071_v40  ;;  %5102 = vmatpush3.bf16.msra.mxu1 %v5077_v41 }
 0x191   :  { %4779 = vmatprep.subr.mxu0 %v5214_v27  ;;  %4784 = vmatprep.subr.mxu1 %v5214_v27 }
 0x193   :  { %4766 = vmatmul.mubr.msk.f32.vlgmr.msra.gmra.mrb[22].mxu0 %vm43_vm0, %v5376_v55  ;;  %4777 = vmatmul.mubr.msk.f32.vlgmr.msra.gmra.mrb[22].mxu1 %vm43_vm0, %v5376_v55 }
 0x194   :  { %4781 = vmatprep.mubr.msk.f32.mxu0 %vm5213_vm1, %v5214_v27  ;;  %4786 = vmatprep.mubr.msk.f32.mxu1 %vm5213_vm1, %v5214_v27 }
 0x20e   :  { %v196_v42 = vpop.f32.mrb[0].mxu0  ;;  %v266_v43 = vpop.f32.mrb[0].mxu1 }
 0x20f   :  { %v4525_v44 = vpop.f32.mrb[1].mxu0  ;;  %v4536_v45 = vpop.f32.mrb[1].mxu1  ;;  %v197_v4 = vadd.f32 %v4202_v62, %v196_v42  ;;  %v267_v5 = vadd.f32 %v4203_v63, %v266_v43 }
 0x216   :  { %v336_v46 = vpop.f32.mrb[2].mxu0  ;;  %v406_v47 = vpop.f32.mrb[2].mxu1 }
 0x217   :  { %v4547_v48 = vpop.f32.mrb[3].mxu0  ;;  %v4558_v49 = vpop.f32.mrb[3].mxu1  ;;  %v337_v16 = vadd.f32 %v4204_v10, %v336_v46  ;;  %v407_v17 = vadd.f32 %v4205_v11, %v406_v47 }
 0x21e   :  { %v479_v50 = vpop.f32.mrb[4].mxu0  ;;  %v549_v51 = vpop.f32.mrb[4].mxu1 }
 0x21f   :  { %v4569_v52 = vpop.f32.mrb[5].mxu0  ;;  %v4580_v53 = vpop.f32.mrb[5].mxu1  ;;  %v480_v25 = vadd.f32 %v4202_v62, %v479_v50  ;;  %v550_v26 = vadd.f32 %v4203_v63, %v549_v51 }
 0x226   :  { %v5592_v54 = vpop.f32.mrb[6].mxu0  ;;  %v5594_v55 = vpop.f32.mrb[6].mxu1 }
 0x227   :  { %v4591_v56 = vpop.f32.mrb[7].mxu0  ;;  %v4602_v57 = vpop.f32.mrb[7].mxu1  ;;  %v620_v34 = vadd.f32 %v4204_v10, %v5592_v54  ;;  %v690_v35 = vadd.f32 %v4205_v11, %v5594_v55 }
 0x22e   :  { %v805_v60 = vpop.f32.mrb[8].mxu0  ;;  %v875_v61 = vpop.f32.mrb[8].mxu1 }
 0x22f   :  { %v806_v0 = vadd.f32 %v4234_v58, %v805_v60  ;;  %v876_v1 = vadd.f32 %v4235_v59, %v875_v61  ;;  %v4613_v2 = vpop.f32.mrb[9].mxu0  ;;  %v4624_v3 = vpop.f32.mrb[9].mxu1  ;;  %v5215_v61 = vmov -1e+30  }
 0x231   :  { %4780 = vmatpush3.xpose.msk.msra.mxu0 %vm1909_vm2, %v806_v0  ;;  %4785 = vmatpush3.xpose.msk.msra.mxu1 %vm1909_vm2, %v876_v1 }
 0x232   :  { %4789 = vmatprep.subr.mxu0 %v5214_v27  ;;  %4794 = vmatprep.subr.mxu1 %v5214_v27 }
 0x234   :  { %4782 = vmatmul.mubr.msk.f32.vlgmr.msra.gmra.mrb[24].mxu0 %vm1909_vm2, %v197_v4  ;;  %4787 = vmatmul.mubr.msk.f32.vlgmr.msra.gmra.mrb[24].mxu1 %vm1909_vm2, %v267_v5 }
 0x235   :  { %4791 = vmatprep.mubr.msk.f32.mxu0 %vm5213_vm1, %v5214_v27  ;;  %4796 = vmatprep.mubr.msk.f32.mxu1 %vm5213_vm1, %v5214_v27 }
 0x236   :  { %v945_v8 = vpop.f32.mrb[10].mxu0  ;;  %v1015_v9 = vpop.f32.mrb[10].mxu1 }
 0x237   :  { %v946_v12 = vadd.f32 %v4236_v6, %v945_v8  ;;  %v1016_v13 = vadd.f32 %v4237_v7, %v1015_v9  ;;  %v4635_v14 = vpop.f32.mrb[11].mxu0  ;;  %v4646_v15 = vpop.f32.mrb[11].mxu1 }
 0x239   :  { %4790 = vmatpush3.xpose.msk.msra.mxu0 %vm1909_vm2, %v946_v12  ;;  %4795 = vmatpush3.xpose.msk.msra.mxu1 %vm1909_vm2, %v1016_v13  ;;  %v5693_v13 = vld [vmem:[%s5922_s1 + $0x8] sm:$0xff] }
 0x23a   :  { %4799 = vmatprep.subr.mxu0 %v5214_v27  ;;  %4804 = vmatprep.subr.mxu1 %v5214_v27  ;;  %vm1906_vm4 = vcmp.gt.f32.partialorder %v5693_v13, 0.0 }
 0x23c   :  { %4792 = vmatmul.mubr.msk.f32.vlgmr.msra.gmra.mrb[26].mxu0 %vm1909_vm2, %v337_v16  ;;  %4797 = vmatmul.mubr.msk.f32.vlgmr.msra.gmra.mrb[26].mxu1 %vm1909_vm2, %v407_v17 }
 0x23d   :  { %4801 = vmatprep.mubr.msk.f32.mxu0 %vm5213_vm1, %v5214_v27  ;;  %4806 = vmatprep.mubr.msk.f32.mxu1 %vm5213_vm1, %v5214_v27 }
 0x23e   :  { %v1085_v18 = vpop.f32.mrb[12].mxu0  ;;  %v1155_v20 = vpop.f32.mrb[12].mxu1 }
 0x23f   :  { %v1086_v21 = vadd.f32 %v4234_v58, %v1085_v18  ;;  %v1156_v22 = vadd.f32 %v4235_v59, %v1155_v20  ;;  %v4657_v23 = vpop.f32.mrb[13].mxu0  ;;  %v4668_v24 = vpop.f32.mrb[13].mxu1  ;;  %v5685_v58 = vld [vmem:[%s5922_s1] sm:$0xff] }
 0x240   :  { %vm1905_vm3 = vcmp.gt.f32.partialorder %v5685_v58, 0.0 }
 0x241   :  { %4800 = vmatpush3.xpose.msk.msra.mxu0 %vm1909_vm2, %v1086_v21  ;;  %4805 = vmatpush3.xpose.msk.msra.mxu1 %vm1909_vm2, %v1156_v22  ;;  %v1907_v62 = vsel %vm1905_vm3, 0.0, %v5215_v61  ;;  %v1908_v21 = vsel %vm1906_vm4, 0.0, %v5215_v61 }
 0x242   :  { %4809 = vmatprep.subr.mxu0 %v5214_v27  ;;  %4814 = vmatprep.subr.mxu1 %v5214_v27 }
 0x244   :  { %4802 = vmatmul.mubr.msk.f32.vlgmr.msra.gmra.mrb[28].mxu0 %vm1909_vm2, %v480_v25  ;;  %4807 = vmatmul.mubr.msk.f32.vlgmr.msra.gmra.mrb[28].mxu1 %vm1909_vm2, %v550_v26 }
 0x245   :  { %4811 = vmatprep.mubr.msk.f32.mxu0 %vm5213_vm1, %v5214_v27  ;;  %4816 = vmatprep.mubr.msk.f32.mxu1 %vm5213_vm1, %v5214_v27 }
 0x246   :  { %v1225_v28 = vpop.f32.mrb[14].mxu0  ;;  %v1295_v29 = vpop.f32.mrb[14].mxu1 }
 0x247   :  { %v1226_v30 = vadd.f32 %v4236_v6, %v1225_v28  ;;  %v1296_v31 = vadd.f32 %v4237_v7, %v1295_v29  ;;  %v4679_v32 = vpop.f32.mrb[15].mxu0  ;;  %v4690_v33 = vpop.f32.mrb[15].mxu1 }
 0x249   :  { %4810 = vmatpush3.xpose.msk.msra.mxu0 %vm1909_vm2, %v1226_v30  ;;  %4815 = vmatpush3.xpose.msk.msra.mxu1 %vm1909_vm2, %v1296_v31 }
 0x24a   :  { %4819 = vmatprep.subr.mxu0 %v5214_v27  ;;  %4824 = vmatprep.subr.mxu1 %v5214_v27 }
 0x24c   :  { %4812 = vmatmul.mubr.msk.f32.vlgmr.msra.gmra.mrb[30].mxu0 %vm1909_vm2, %v620_v34  ;;  %4817 = vmatmul.mubr.msk.f32.vlgmr.msra.gmra.mrb[30].mxu1 %vm1909_vm2, %v690_v35 }
 0x24d   :  { %4821 = vmatprep.mubr.msk.f32.mxu0 %vm5213_vm1, %v5214_v27  ;;  %4826 = vmatprep.mubr.msk.f32.mxu1 %vm5213_vm1, %v5214_v27 }
 0x24e   :  { %v1411_v38 = vpop.f32.mrb[16].mxu0  ;;  %v1481_v39 = vpop.f32.mrb[16].mxu1 }
 0x24f   :  { %v1412_v40 = vadd.f32 %v4266_v36, %v1411_v38  ;;  %v1482_v41 = vadd.f32 %v4267_v37, %v1481_v39  ;;  %v4701_v42 = vpop.f32.mrb[17].mxu0  ;;  %v4712_v43 = vpop.f32.mrb[17].mxu1 }
 0x251   :  { %4820 = vmatpush3.msra.mxu0 %v1412_v40  ;;  %4825 = vmatpush3.msra.mxu1 %v1482_v41 }
 0x252   :  { %4829 = vmatprep.subr.mxu0 %v5214_v27  ;;  %4834 = vmatprep.subr.mxu1 %v5214_v27 }
 0x256   :  { %v5670_v44 = vpop.f32.mrb[18].mxu0  ;;  %v5672_v45 = vpop.f32.mrb[18].mxu1 }
 0x257   :  { %v4723_v46 = vpop.f32.mrb[19].mxu0  ;;  %v4734_v47 = vpop.f32.mrb[19].mxu1 }
 0x25e   :  { %v1691_v48 = vpop.f32.mrb[20].mxu0  ;;  %v1761_v49 = vpop.f32.mrb[20].mxu1 }
 0x25f   :  { %v5674_v50 = vadd.f32 %v4266_v36, %v1691_v48  ;;  %v5676_v51 = vadd.f32 %v4267_v37, %v1761_v49  ;;  %v4745_v52 = vpop.f32.mrb[21].mxu0  ;;  %v4756_v53 = vpop.f32.mrb[21].mxu1 }
 0x266   :  { %v5678_v54 = vpop.f32.mrb[22].mxu0  ;;  %v5680_v55 = vpop.f32.mrb[22].mxu1 }
 0x267   :  { %v4767_v56 = vpop.f32.mrb[23].mxu0  ;;  %v4778_v57 = vpop.f32.mrb[23].mxu1 }
 0x307   :  { %v1982_v59 = vpop.f32.mrb[24].mxu0  ;;  %v2058_v60 = vpop.f32.mrb[24].mxu1 }
 0x308   :  { %v2518_v63 = vmul.f32 0.35355338, %v1982_v59  ;;  %v2519_v0 = vmul.f32 0.35355338, %v2058_v60  ;;  %v4783_v1 = vpop.f32.mrb[25].mxu0  ;;  %v4788_v2 = vpop.f32.mrb[25].mxu1 }
 0x30a   :  { %v2527_v3 = vadd.f32 %v2519_v0, %v1907_v62  ;;  %v2526_v4 = vadd.f32 %v2518_v63, %v1907_v62 }
 0x30c   :  { %v2537_v5 = vsel %vm1909_vm2, %v2527_v3, -inf  ;;  %v2534_v6 = vsel %vm1909_vm2, %v2526_v4, -inf }
 0x30d   :  { %2538 = vmax.xlane.f32.xlu1 %v2537_v5  ;;  %2535 = vmax.xlane.f32.xlu0 %v2534_v6 }
 0x30f   :  { %v2134_v7 = vpop.f32.mrb[26].mxu0  ;;  %v2210_v8 = vpop.f32.mrb[26].mxu1 }
 0x310   :  { %v2520_v9 = vmul.f32 0.35355338, %v2134_v7  ;;  %v2521_v10 = vmul.f32 0.35355338, %v2210_v8  ;;  %v4793_v11 = vpop.f32.mrb[27].mxu0  ;;  %v4798_v12 = vpop.f32.mrb[27].mxu1 }
 0x312   :  { %v2529_v14 = vadd.f32 %v2521_v10, %v1907_v62  ;;  %v2528_v15 = vadd.f32 %v2520_v9, %v1907_v62 }
 0x314   :  { %v2543_v16 = vsel %vm1909_vm2, %v2529_v14, -inf  ;;  %v2540_v17 = vsel %vm1909_vm2, %v2528_v15, -inf }
 0x315   :  { %2544 = vmax.xlane.f32.xlu1 %v2543_v16  ;;  %2541 = vmax.xlane.f32.xlu0 %v2540_v17 }
 0x317   :  { %v2286_v18 = vpop.f32.mrb[28].mxu0  ;;  %v2362_v20 = vpop.f32.mrb[28].mxu1 }
 0x318   :  { %v2522_v22 = vmul.f32 0.35355338, %v2286_v18  ;;  %v2523_v23 = vmul.f32 0.35355338, %v2362_v20  ;;  %v4803_v24 = vpop.f32.mrb[29].mxu0  ;;  %v4808_v25 = vpop.f32.mrb[29].mxu1 }
 0x31a   :  { %v2531_v26 = vadd.f32 %v2523_v23, %v1908_v21  ;;  %v2530_v28 = vadd.f32 %v2522_v22, %v1908_v21 }
 0x31c   :  { %v2549_v29 = vsel %vm1909_vm2, %v2531_v26, -inf  ;;  %v2546_v30 = vsel %vm1909_vm2, %v2530_v28, -inf }
 0x31d   :  { %2550 = vmax.xlane.f32.xlu1 %v2549_v29  ;;  %2547 = vmax.xlane.f32.xlu0 %v2546_v30 }
 0x31f   :  { %v2438_v31 = vpop.f32.mrb[30].mxu0  ;;  %v2514_v32 = vpop.f32.mrb[30].mxu1 }
 0x320   :  { %v2524_v33 = vmul.f32 0.35355338, %v2438_v31  ;;  %v2525_v34 = vmul.f32 0.35355338, %v2514_v32  ;;  %v4813_v35 = vpop.f32.mrb[31].mxu0  ;;  %v4818_v36 = vpop.f32.mrb[31].mxu1 }
 0x321   :  { %v4268_v35 = vld [vmem:[%s5924_s3 + $0xa] ss:$0 sm:$0xff] }
 0x322   :  { %v2533_v37 = vadd.f32 %v2525_v34, %v1908_v21  ;;  %v2532_v38 = vadd.f32 %v2524_v33, %v1908_v21  ;;  %v4269_v33 = vld [vmem:[%s5924_s3 + $0xb] ss:$0 sm:$0xff] }
 0x324   :  { %v2555_v39 = vsel %vm1909_vm2, %v2533_v37, -inf  ;;  %v2552_v40 = vsel %vm1909_vm2, %v2532_v38, -inf }
 0x325   :  { %2556 = vmax.xlane.f32.xlu1 %v2555_v39  ;;  %2553 = vmax.xlane.f32.xlu0 %v2552_v40  ;;  %v1552_v40 = vadd.f32 %v4268_v35, %v5670_v44 }
 0x39a   :  { %v2539_v41 = vpop.xlane.xlu1 %2538  ;;  %v2536_v42 = vpop.xlane.xlu0 %2535 }
 0x39b   :  { %v2559_v43 = vsub.f32 %v2527_v3, %v2539_v41  ;;  %v2558_v46 = vsub.f32 %v2526_v4, %v2536_v42 }
 0x39d   :  { %v2568_v47 = vmul.f32 1.442695, %v2559_v43  ;;  %v2566_v48 = vmul.f32 1.442695, %v2558_v46 }
 0x39f   :  { %5150 = vpow2.f32 %v2568_v47 }
 0x3a0   :  { %5152 = vpow2.f32 %v2566_v48 }
 0x3a2   :  { %v2545_v49 = vpop.xlane.xlu1 %2544  ;;  %v2542_v52 = vpop.xlane.xlu0 %2541 }
 0x3a3   :  { %v2561_v53 = vsub.f32 %v2529_v14, %v2545_v49  ;;  %v2560_v56 = vsub.f32 %v2528_v15, %v2542_v52 }
 0x3a5   :  { %v2572_v57 = vmul.f32 1.442695, %v2561_v53  ;;  %v2570_v59 = vmul.f32 1.442695, %v2560_v56 }
 0x3a7   :  { %5154 = vpow2.f32 %v2572_v57 }
 0x3a8   :  { %5156 = vpow2.f32 %v2570_v59  ;;  %v1902_v59 = vadd.f32 %v4269_v33, %v5680_v55 }
 0x3a9   :  { %v5151_v60 = vpop.eup %5150 }
 0x3aa   :  { %v5153_v61 = vpop.eup %5152  ;;  %v2551_v62 = vpop.xlane.xlu1 %2550  ;;  %v2585_v0 = vsel %vm1909_vm2, %v5151_v60, 0.0 }
 0x3ab   :  { %v2548_v63 = vpop.xlane.xlu0 %2547  ;;  %v2563_v1 = vsub.f32 %v2531_v26, %v2551_v62  ;;  %2586 = vadd.xlane.f32.xlu1 %v2585_v0  ;;  %v2582_v3 = vsel %vm1909_vm2, %v5153_v61, 0.0 }
 0x3ac   :  { %v2562_v2 = vsub.f32 %v2530_v28, %v2548_v63  ;;  %2583 = vadd.xlane.f32.xlu0 %v2582_v3 }
 0x3ad   :  { %v2576_v4 = vmul.f32 1.442695, %v2563_v1  ;;  %v3214_v1 = vld [vmem:[%s5925_s4] sm:$0xff] }
 0x3ae   :  { %v2574_v5 = vmul.f32 1.442695, %v2562_v2  ;;  %v3215_v2 = vld [vmem:[%s5925_s4 + $0x8] sm:$0xff] }
 0x3af   :  { %5158 = vpow2.f32 %v2576_v4  ;;  %v3216_v4 = vld [vmem:[%s5925_s4 + $0x10] sm:$0xff] }
 0x3b0   :  { %5160 = vpow2.f32 %v2574_v5 }
 0x3b1   :  { %v5155_v6 = vpop.eup %5154 }
 0x3b2   :  { %v5157_v7 = vpop.eup %5156  ;;  %v2557_v8 = vpop.xlane.xlu1 %2556  ;;  %v2591_v10 = vsel %vm1909_vm2, %v5155_v6, 0.0 }
 0x3b3   :  { %v2554_v9 = vpop.xlane.xlu0 %2553  ;;  %v2565_v11 = vsub.f32 %v2533_v37, %v2557_v8  ;;  %2592 = vadd.xlane.f32.xlu1 %v2591_v10  ;;  %v2588_v14 = vsel %vm1909_vm2, %v5157_v7, 0.0 }
 0x3b4   :  { %v2564_v12 = vsub.f32 %v2532_v38, %v2554_v9  ;;  %2589 = vadd.xlane.f32.xlu0 %v2588_v14  ;;  %v1622_v38 = vadd.f32 %v4269_v33, %v5672_v45 }
 0x3b5   :  { %v2580_v15 = vmul.f32 1.442695, %v2565_v11 }
 0x3b6   :  { %v2578_v16 = vmul.f32 1.442695, %v2564_v12 }
 0x3b7   :  { %5162 = vpow2.f32 %v2580_v15 }
 0x3b8   :  { %5164 = vpow2.f32 %v2578_v16 }
 0x3b9   :  { %v5159_v17 = vpop.eup %5158 }
 0x3ba   :  { %v5161_v18 = vpop.eup %5160  ;;  %v2597_v20 = vsel %vm1909_vm2, %v5159_v17, 0.0 }
 0x3bb   :  { %2598 = vadd.xlane.f32.xlu1 %v2597_v20  ;;  %v2594_v21 = vsel %vm1909_vm2, %v5161_v18, 0.0 }
 0x3bc   :  { %2595 = vadd.xlane.f32.xlu0 %v2594_v21 }
 0x3c1   :  { %v5708_v22 = vpop.eup %5162 }
 0x3c2   :  { %v5710_v23 = vpop.eup %5164  ;;  %v2603_v24 = vsel %vm1909_vm2, %v5708_v22, 0.0 }
 0x3c3   :  { %2604 = vadd.xlane.f32.xlu1 %v2603_v24  ;;  %v2600_v25 = vsel %vm1909_vm2, %v5710_v23, 0.0 }
 0x3c4   :  { %2601 = vadd.xlane.f32.xlu0 %v2600_v25 }
 0x438   :  { %v2587_v26 = vpop.xlane.xlu1 %2586 }
 0x439   :  { %5166 = vrcp.f32 %v2587_v26  ;;  %v2584_v28 = vpop.xlane.xlu0 %2583 }
 0x43a   :  { %5168 = vrcp.f32 %v2584_v28 }
 0x440   :  { %v2593_v29 = vpop.xlane.xlu1 %2592 }
 0x441   :  { %5170 = vrcp.f32 %v2593_v29  ;;  %v2590_v30 = vpop.xlane.xlu0 %2589 }
 0x442   :  { %5172 = vrcp.f32 %v2590_v30 }
 0x443   :  { %v5167_v31 = vpop.eup %5166 }
 0x444   :  { %v5169_v32 = vpop.eup %5168  ;;  %v2615_v34 = vmul.f32 %v5167_v31, %v5151_v60  ;;  %v1832_v60 = vadd.f32 %v4268_v35, %v5678_v54 }
 0x445   :  { %v2614_v36 = vmul.f32 %v5169_v32, %v5153_v61 }
 0x446   :  { %v2623_v37 = vmul.f32 %v2615_v34, %v5685_v58 }
 0x447   :  { %v2622_v39 = vmul.f32 %v2614_v36, %v5685_v58  ;;  %v4310_v36 = vld [vmem:[%s5926_s5 + $0x2] ss:$0 sm:$0xff] }
 0x448   :  { %4827 = vmatmul.mubr.msk.f32.vlgmr.msra.gmra.mrb[32].mxu1 %vm1909_vm2, %v2623_v37  ;;  %v2599_v41 = vpop.xlane.xlu1 %2598 }
 0x449   :  { %4835 = vmatpush3.msra.mxu1 %v1622_v38  ;;  %5174 = vrcp.f32 %v2599_v41  ;;  %4822 = vmatmul.mubr.msk.f32.vlgmr.msra.gmra.mrb[32].mxu0 %vm1909_vm2, %v2622_v39  ;;  %v2596_v42 = vpop.xlane.xlu0 %2595 }
 0x44a   :  { %4830 = vmatpush3.msra.mxu0 %v1552_v40  ;;  %5176 = vrcp.f32 %v2596_v42  ;;  %4831 = vmatprep.mubr.msk.f32.mxu0 %vm5213_vm1, %v5214_v27 }
 0x44b   :  { %v5171_v43 = vpop.eup %5170  ;;  %4836 = vmatprep.mubr.msk.f32.mxu1 %vm5213_vm1, %v5214_v27  ;;  %4839 = vmatprep.subr.mxu0 %v5214_v27 }
 0x44c   :  { %v5173_v44 = vpop.eup %5172  ;;  %v2617_v45 = vmul.f32 %v5171_v43, %v5155_v6  ;;  %4844 = vmatprep.subr.mxu1 %v5214_v27 }
 0x44d   :  { %v2616_v46 = vmul.f32 %v5173_v44, %v5157_v7  ;;  %v5186_v44 = vld [vmem:[%s5921_s0] sm:$0xff] }
 0x44e   :  { %v2625_v47 = vmul.f32 %v2617_v45, %v5685_v58 }
 0x44f   :  { %v2624_v48 = vmul.f32 %v2616_v46, %v5685_v58 }
 0x450   :  { %4837 = vmatmul.mubr.msk.f32.vlgmr.msra.gmra.mrb[34].mxu1 %vm1909_vm2, %v2625_v47  ;;  %v2605_v49 = vpop.xlane.xlu1 %2604 }
 0x451   :  { %4845 = vmatpush3.msra.mxu1 %v5676_v51  ;;  %5178 = vrcp.f32 %v2605_v49  ;;  %4832 = vmatmul.mubr.msk.f32.vlgmr.msra.gmra.mrb[34].mxu0 %vm1909_vm2, %v2624_v48  ;;  %v2602_v52 = vpop.xlane.xlu0 %2601 }
 0x452   :  { %4840 = vmatpush3.msra.mxu0 %v5674_v50  ;;  %5180 = vrcp.f32 %v2602_v52  ;;  %4841 = vmatprep.mubr.msk.f32.mxu0 %vm5213_vm1, %v5214_v27 }
 0x453   :  { %v5175_v53 = vpop.eup %5174  ;;  %4846 = vmatprep.mubr.msk.f32.mxu1 %vm5213_vm1, %v5214_v27  ;;  %4849 = vmatprep.subr.mxu0 %v5214_v27 }
 0x454   :  { %v5177_v58 = vpop.eup %5176  ;;  %v2619_v56 = vmul.f32 %v5175_v53, %v5159_v17  ;;  %4854 = vmatprep.subr.mxu1 %v5214_v27 }
 0x455   :  { %v2618_v51 = vmul.f32 %v5177_v58, %v5161_v18 }
 0x456   :  { %v2627_v57 = vmul.f32 %v2619_v56, %v5693_v13 }
 0x457   :  { %v2626_v50 = vmul.f32 %v2618_v51, %v5693_v13 }
 0x458   :  { %4847 = vmatmul.mubr.msk.f32.vlgmr.msra.gmra.mrb[36].mxu1 %vm1909_vm2, %v2627_v57 }
 0x459   :  { %4842 = vmatmul.mubr.msk.f32.vlgmr.msra.gmra.mrb[36].mxu0 %vm1909_vm2, %v2626_v50  ;;  %4855 = vmatpush3.msra.mxu1 %v1902_v59 }
 0x45a   :  { %4850 = vmatpush3.msra.mxu0 %v1832_v60  ;;  %4851 = vmatprep.mubr.msk.f32.mxu0 %vm5213_vm1, %v5214_v27 }
 0x45b   :  { %v5179_v61 = vpop.eup %5178  ;;  %4856 = vmatprep.mubr.msk.f32.mxu1 %vm5213_vm1, %v5214_v27  ;;  %4859 = vmatprep.subr.mxu0 %v5214_v27 }
 0x45c   :  { %v5181_v55 = vpop.eup %5180  ;;  %v2621_v62 = vmul.f32 %v5179_v61, %v5708_v22  ;;  %4864 = vmatprep.subr.mxu1 %v5214_v27  ;;  %v5187_v61 = vld [vmem:[%s5921_s0 + $0x8] sm:$0xff] }
 0x45d   :  { %v2620_v54 = vmul.f32 %v5181_v55, %v5710_v23 }
 0x45e   :  { %v2629_v63 = vmul.f32 %v2621_v62, %v5693_v13 }
 0x45f   :  { %v2628_v0 = vmul.f32 %v2620_v54, %v5693_v13  ;;  %v3217_v13 = vld [vmem:[%s5925_s4 + $0x18] sm:$0xff] }
 0x460   :  { %4857 = vmatmul.mubr.msk.f32.vlgmr.msra.gmra.mrb[38].mxu1 %vm1909_vm2, %v2629_v63 }
 0x461   :  { %4852 = vmatmul.mubr.msk.f32.vlgmr.msra.gmra.mrb[38].mxu0 %vm1909_vm2, %v2628_v0  ;;  %4866 = vmatprep.mubr.msk.f32.mxu1 %vm5213_vm1, %v5214_v27 }
 0x462   :  { %4861 = vmatprep.mubr.msk.f32.mxu0 %vm5213_vm1, %v5214_v27  ;;  %4860 = vmatpush3.msra.mxu0 %v3214_v1 }
 0x463   :  { %4865 = vmatpush3.msra.mxu1 %v3215_v2  ;;  %4869 = vmatprep.subr.mxu0 %v5214_v27 }
 0x464   :  { %4874 = vmatprep.subr.mxu1 %v5214_v27 }
 0x51b   :  { %v2772_v3 = vpop.f32.mrb[32].mxu1 }
 0x51c   :  { %v2699_v5 = vpop.f32.mrb[32].mxu0  ;;  %v4828_v6 = vpop.f32.mrb[33].mxu1  ;;  %4867 = vmatmul.mubr.msk.f32.vlgmr.msra.gmra.mrb[40].mxu1 %vm1909_vm2, %v2772_v3 }
 0x51d   :  { %v4823_v7 = vpop.f32.mrb[33].mxu0  ;;  %4862 = vmatmul.mubr.msk.f32.vlgmr.msra.gmra.mrb[40].mxu0 %vm1909_vm2, %v2699_v5  ;;  %4875 = vmatpush3.msra.mxu1 %v3217_v13 }
 0x51e   :  { %4870 = vmatpush3.msra.mxu0 %v3216_v4  ;;  %4871 = vmatprep.mubr.msk.f32.mxu0 %vm5213_vm1, %v5214_v27  ;;  %v3862_v7 = vld [vmem:[%s5927_s6] sm:$0xff] }
 0x51f   :  { %4876 = vmatprep.mubr.msk.f32.mxu1 %vm5213_vm1, %v5214_v27  ;;  %4879 = vmatprep.subr.mxu0 %v5214_v27 }
 0x520   :  { %4884 = vmatprep.subr.mxu1 %v5214_v27 }
 0x523   :  { %v2918_v8 = vpop.f32.mrb[34].mxu1 }
 0x524   :  { %v2845_v9 = vpop.f32.mrb[34].mxu0  ;;  %v4838_v10 = vpop.f32.mrb[35].mxu1  ;;  %4877 = vmatmul.mubr.msk.f32.vlgmr.msra.gmra.mrb[42].mxu1 %vm1909_vm2, %v2918_v8  ;;  %v3863_v8 = vld [vmem:[%s5927_s6 + $0x8] sm:$0xff] }
 0x525   :  { %v4833_v11 = vpop.f32.mrb[35].mxu0  ;;  %4872 = vmatmul.mubr.msk.f32.vlgmr.msra.gmra.mrb[42].mxu0 %vm1909_vm2, %v2845_v9  ;;  %4885 = vmatpush3.msra.mxu1 %v3215_v2  ;;  %v5104_v9 = vpack.c.bf16 %v3863_v8, %v3862_v7  ;;  %v3864_v10 = vld [vmem:[%s5927_s6 + $0x10] sm:$0xff] }
 0x526   :  { %4880 = vmatpush3.msra.mxu0 %v3214_v1  ;;  %4881 = vmatprep.mubr.msk.f32.mxu0 %vm5213_vm1, %v5214_v27  ;;  %v3865_v11 = vld [vmem:[%s5927_s6 + $0x18] sm:$0xff] }
 0x527   :  { %4886 = vmatprep.mubr.msk.f32.mxu1 %vm5213_vm1, %v5214_v27  ;;  %4889 = vmatprep.subr.mxu0 %v5214_v27 }
 0x528   :  { %4894 = vmatprep.subr.mxu1 %v5214_v27 }
 0x52b   :  { %v3064_v12 = vpop.f32.mrb[36].mxu1 }
 0x52c   :  { %v2991_v14 = vpop.f32.mrb[36].mxu0  ;;  %v4848_v15 = vpop.f32.mrb[37].mxu1  ;;  %4887 = vmatmul.mubr.msk.f32.vlgmr.msra.gmra.mrb[44].mxu1 %vm1909_vm2, %v3064_v12  ;;  %v5107_v12 = vpack.c.bf16 %v3865_v11, %v3864_v10 }
 0x52d   :  { %v4843_v16 = vpop.f32.mrb[37].mxu0  ;;  %4882 = vmatmul.mubr.msk.f32.vlgmr.msra.gmra.mrb[44].mxu0 %vm1909_vm2, %v2991_v14  ;;  %4895 = vmatpush3.msra.mxu1 %v3217_v13 }
 0x52e   :  { %4890 = vmatpush3.msra.mxu0 %v3216_v4  ;;  %4891 = vmatprep.mubr.msk.f32.mxu0 %vm5213_vm1, %v5214_v27 }
 0x52f   :  { %4896 = vmatprep.mubr.msk.f32.mxu1 %vm5213_vm1, %v5214_v27  ;;  %5103 = vmatprep.subr.bf16.mxu0 %v5212_v19 }
 0x530   :  { %5109 = vmatprep.subr.bf16.mxu1 %v5212_v19 }
 0x533   :  { %v3210_v17 = vpop.f32.mrb[38].mxu1 }
 0x534   :  { %v3137_v18 = vpop.f32.mrb[38].mxu0  ;;  %v4858_v20 = vpop.f32.mrb[39].mxu1  ;;  %4897 = vmatmul.mubr.msk.f32.vlgmr.msra.gmra.mrb[46].mxu1 %vm1909_vm2, %v3210_v17 }
 0x535   :  { %v4853_v21 = vpop.f32.mrb[39].mxu0  ;;  %4892 = vmatmul.mubr.msk.f32.vlgmr.msra.gmra.mrb[46].mxu0 %vm1909_vm2, %v3137_v18  ;;  %4918 = vmatprep.mubr.msk.f32.mxu1 %vm5213_vm1, %v5214_v27  ;;  %v4311_v18 = vld [vmem:[%s5926_s5 + $0x3] ss:$0 sm:$0xff] }
 0x536   :  { %4907 = vmatprep.mubr.msk.f32.mxu0 %vm5213_vm1, %v5214_v27  ;;  %5105 = vmatpush3.bf16.msra.mxu0 %v5104_v9 }
 0x537   :  { %5111 = vmatpush3.bf16.msra.mxu1 %v5104_v9  ;;  %5106 = vmatprep.subr.bf16.mxu0 %v5212_v19 }
 0x538   :  { %5112 = vmatprep.subr.bf16.mxu1 %v5212_v19 }
 0x53a   :  { %5108 = vmatpush3.bf16.msra.mxu0 %v5107_v12 }
 0x53b   :  { %5114 = vmatpush3.bf16.msra.mxu1 %v5107_v12  ;;  %5115 = vmatprep.subr.bf16.mxu0 %v5212_v19 }
 0x53c   :  { %5127 = vmatprep.subr.bf16.mxu1 %v5212_v19 }
 0x5ef   :  { %v3360_v22 = vpop.f32.mrb[40].mxu1 }
 0x5f0   :  { %v3287_v23 = vpop.f32.mrb[40].mxu0  ;;  %v3803_v24 = vsel %vm43_vm0, %v3360_v22, 0.0  ;;  %v4868_v25 = vpop.f32.mrb[41].mxu1  ;;  %v3866_v22 = vld [vmem:[%s5929_s8] sm:$0xff] }
 0x5f1   :  { %v3802_v26 = vsel %vm43_vm0, %v3287_v23, 0.0  ;;  %v4863_v28 = vpop.f32.mrb[41].mxu0  ;;  %v3867_v23 = vld [vmem:[%s5929_s8 + $0x8] sm:$0xff]  ;;  %v4312_v25 = vld [vmem:[%s5926_s5 + $0x4] ss:$0 sm:$0xff] }
 0x5f2   :  { %v3804_v29 = vadd.f32 %v3803_v24, %v3802_v26 }
 0x5f7   :  { %v3506_v30 = vpop.f32.mrb[42].mxu1 }
 0x5f8   :  { %v3433_v31 = vpop.f32.mrb[42].mxu0  ;;  %v4878_v32 = vpop.f32.mrb[43].mxu1  ;;  %v3807_v37 = vsel %vm43_vm0, %v3506_v30, 0.0 }
 0x5f9   :  { %v3805_v33 = vsel %vm43_vm0, %v3433_v31, 0.0  ;;  %v4873_v34 = vpop.f32.mrb[43].mxu0  ;;  %v3868_v31 = vld [vmem:[%s5929_s8 + $0x10] sm:$0xff]  ;;  %v3869_v32 = vld [vmem:[%s5929_s8 + $0x18] sm:$0xff] }
 0x5fa   :  { %v3806_v35 = vadd.f32 %v3805_v33, %v3804_v29  ;;  %v5116_v29 = vpack.c.bf16 %v3867_v23, %v3866_v22  ;;  %v5119_v33 = vpack.c.bf16 %v3869_v32, %v3868_v31  ;;  %v3870_v34 = vld [vmem:[%s5929_s8 + $0x20] sm:$0xff] }
 0x5fc   :  { %v3808_v38 = vadd.f32 %v3807_v37, %v3806_v35  ;;  %v3871_v35 = vld [vmem:[%s5929_s8 + $0x28] sm:$0xff] }
 0x5fe   :  { %v3820_v39 = vadd.f32 %v4310_v36, %v3808_v38 }
 0x5ff   :  { %v3652_v40 = vpop.f32.mrb[44].mxu1 }
 0x600   :  { %v3579_v41 = vpop.f32.mrb[44].mxu0  ;;  %v3810_v42 = vsel %vm43_vm0, %v3652_v40, 0.0  ;;  %v4888_v43 = vpop.f32.mrb[45].mxu1  ;;  %v5823_v45 = vadd.f32 %v5186_v44, %v3820_v39 }
 0x601   :  { %v3809_v46 = vsel %vm43_vm0, %v3579_v41, 0.0  ;;  %v4883_v47 = vpop.f32.mrb[45].mxu0  ;;  %v3872_v41 = vld [vmem:[%s5929_s8 + $0x30] sm:$0xff] }
 0x602   :  { %v3811_v48 = vadd.f32 %v3810_v42, %v3809_v46  ;;  %v3824_v49 = vsel %vm43_vm0, %v5823_v45, 0.0  ;;  %v3873_v42 = vld [vmem:[%s5929_s8 + $0x38] sm:$0xff] }
 0x603   :  { %3825 = vadd.xlane.f32.xlu0 %v3824_v49  ;;  %v5125_v43 = vpack.c.bf16 %v3873_v42, %v3872_v41 }
 0x607   :  { %v3798_v52 = vpop.f32.mrb[46].mxu1 }
 0x608   :  { %v3725_v53 = vpop.f32.mrb[46].mxu0  ;;  %v4898_v58 = vpop.f32.mrb[47].mxu1  ;;  %v3814_v59 = vsel %vm43_vm0, %v3798_v52, 0.0 }
 0x609   :  { %v3812_v56 = vsel %vm43_vm0, %v3725_v53, 0.0  ;;  %v4893_v51 = vpop.f32.mrb[47].mxu0  ;;  %v4316_v58 = vld [vmem:[%s5926_s5 + $0x5] ss:$0 sm:$0xff] }
 0x60a   :  { %v3813_v57 = vadd.f32 %v3812_v56, %v3811_v48 }
 0x60c   :  { %v3815_v50 = vadd.f32 %v3814_v59, %v3813_v57 }
 0x60e   :  { %v3821_v60 = vadd.f32 %v4310_v36, %v3815_v50  ;;  %v5122_v36 = vpack.c.bf16 %v3871_v35, %v3870_v34 }
 0x610   :  { %v5833_v55 = vadd.f32 %v5187_v61, %v3821_v60 }
 0x612   :  { %v3827_v62 = vsel %vm43_vm0, %v5833_v55, 0.0 }
 0x613   :  { %3828 = vadd.xlane.f32.xlu1 %v3827_v62 }
 0x690   :  { %v3826_v54 = vpop.xlane.xlu0 %3825 }
 0x691   :  { %v3830_v63 = vmul.f32 0.03125, %v3826_v54 }
 0x693   :  { %v3832_v0 = vsub.f32 %v5823_v45, %v3830_v63 }
 0x695   :  { %v3834_v1 = vmul.f32 %v3832_v0, %v3832_v0 }
 0x697   :  { %v3836_v2 = vsel %vm43_vm0, %v3834_v1, 0.0 }
 0x698   :  { %3837 = vadd.xlane.f32.xlu0 %v3836_v2 }
 0x6a0   :  { %v3829_v13 = vpop.xlane.xlu1 %3828 }
 0x6a1   :  { %v3831_v3 = vmul.f32 0.03125, %v3829_v13 }
 0x6a3   :  { %v3833_v4 = vsub.f32 %v5833_v55, %v3831_v3 }
 0x6a5   :  { %v3835_v5 = vmul.f32 %v3833_v4, %v3833_v4 }
 0x6a7   :  { %v3839_v6 = vsel %vm43_vm0, %v3835_v5, 0.0 }
 0x6a8   :  { %3840 = vadd.xlane.f32.xlu1 %v3839_v6 }
 0x725   :  { %v3838_v14 = vpop.xlane.xlu0 %3837 }
 0x726   :  { %v3842_v15 = vmul.f32 0.03125, %v3838_v14 }
 0x728   :  { %v3844_v16 = vadd.f32 1e-05, %v3842_v15 }
 0x72a   :  { %5182 = vrsqrt.f32 %v3844_v16 }
 0x734   :  { %v5183_v17 = vpop.eup %5182 }
 0x735   :  { %v3848_v20 = vmul.f32 %v5183_v17, %v3832_v0  ;;  %v3841_v21 = vpop.xlane.xlu1 %3840 }
 0x736   :  { %v3843_v24 = vmul.f32 0.03125, %v3841_v21 }
 0x737   :  { %v3854_v26 = vmul.f32 %v4311_v18, %v3848_v20 }
 0x738   :  { %v3845_v28 = vadd.f32 1e-05, %v3843_v24 }
 0x739   :  { %v3860_v30 = vadd.f32 %v4312_v25, %v3854_v26 }
 0x73a   :  { %5184 = vrsqrt.f32 %v3845_v28 }
 0x73b   :  { %4908 = vmatmul.mubr.msk.f32.vlgmr.msra.gmra.mrb[48].mxu0 %vm43_vm0, %v3860_v30 }
 0x73c   :  { %5117 = vmatpush3.bf16.msra.mxu0 %v5116_v29  ;;  %4937 = vmatprep.mubr.msk.f32.mxu0 %vm5213_vm1, %v5214_v27 }
 0x73d   :  { %5118 = vmatprep.subr.bf16.mxu0 %v5212_v19 }
 0x740   :  { %5120 = vmatpush3.bf16.msra.mxu0 %v5119_v33 }
 0x741   :  { %5121 = vmatprep.subr.bf16.mxu0 %v5212_v19 }
 0x744   :  { %v5185_v37 = vpop.eup %5184  ;;  %5123 = vmatpush3.bf16.msra.mxu0 %v5122_v36 }
 0x745   :  { %v3849_v38 = vmul.f32 %v5185_v37, %v3833_v4  ;;  %5124 = vmatprep.subr.bf16.mxu0 %v5212_v19 }
 0x747   :  { %v3855_v39 = vmul.f32 %v4311_v18, %v3849_v38 }
 0x748   :  { %5126 = vmatpush3.bf16.msra.mxu0 %v5125_v43 }
 0x749   :  { %v3861_v40 = vadd.f32 %v4312_v25, %v3855_v39 }
 0x74b   :  { %4919 = vmatmul.mubr.msk.f32.vlgmr.msra.gmra.mrb[48].mxu1 %vm43_vm0, %v3861_v40 }
 0x74c   :  { %5129 = vmatpush3.bf16.msra.mxu1 %v5116_v29  ;;  %4956 = vmatprep.mubr.msk.f32.mxu1 %vm5213_vm1, %v5214_v27  ;;  %v4313_v27 = vld [vmem:[%s5928_s7] ss:$0 sm:$0xff]  ;;  %s5216_s7 = smov [#allocation2]  }
 0x74d   :  { %5130 = vmatprep.subr.bf16.mxu1 %v5212_v19  ;;  %s4189_s27 = sshll.u32 %s5216_s7, 4  ;;  %s4190_s27 = int_to_ptr.vmem [resolvable:$true] %s4189_s27 }
 0x74e   :  { %s5188_s28 = scalar_lea.vmem %s4190_s27, 256  ;;  %p5193_p1 = scmp.lt.s32.totalorder %s4190_s27, %s4190_s27 }
 0x74f   :  { %p5189_p0 = scmp.ne.s32.totalorder %s4190_s27, %s5188_s28  ;;  %p5194_p2 = scmp.lt.s32.totalorder %s5188_s28, %s5188_s28 }
 0x750   :  { %5132 = vmatpush3.bf16.msra.mxu1 %v5119_v33 }
 0x751   :  { %5133 = vmatprep.subr.bf16.mxu1 %v5212_v19  ;;  %p5195_p3 = por %p5194_p2, %p5193_p1 }
 0x753   :  { %p5196_p4 = pnand %p5195_p3, %p5189_p0 }
 0x754   :  { %5135 = vmatpush3.bf16.msra.mxu1 %v5122_v36 }
 0x755   :  { %5136 = vmatprep.subr.bf16.mxu1 %v5212_v19 }
 0x758   :  { %5138 = vmatpush3.bf16.msra.mxu1 %v5125_v43 }
 0x80e   :  { %v3950_v44 = vpop.f32.mrb[48].mxu0 }
 0x80f   :  { %v3951_v46 = vadd.f32 %v4313_v27, %v3950_v44  ;;  %v4909_v47 = vpop.f32.mrb[49].mxu0 }
 0x811   :  { %v4027_v19 = vmax.f32 %v3951_v46, 0.0 }
 0x813   :  { %4938 = vmatmul.mubr.msk.f32.vlgmr.msra.gmra.mrb[50].mxu0 %vm4033_vm5, %v4027_v19 }
 0x81e   :  { %v4023_v48 = vpop.f32.mrb[48].mxu1 }
 0x81f   :  { %v4024_v49 = vadd.f32 %v4313_v27, %v4023_v48  ;;  %v4920_v52 = vpop.f32.mrb[49].mxu1 }
 0x821   :  { %v4028_v53 = vmax.f32 %v4024_v49, 0.0 }
 0x823   :  { %4957 = vmatmul.mubr.msk.f32.vlgmr.msra.gmra.mrb[50].mxu1 %vm4033_vm5, %v4028_v53 }
 0x8e6   :  { %v4103_v56 = vpop.f32.mrb[50].mxu0 }
 0x8e7   :  { %v4104_v51 = vadd.f32 %v4316_v58, %v4103_v56  ;;  %v4939_v57 = vpop.f32.mrb[51].mxu0 }
 0x8e9   :  { %v4180_v59 = vadd.f32 %v4104_v51, %v5823_v45 }
 0x8eb   :  { %4182 = vst.msk [vmem:[#allocation2] sm:$0xff] %vm43_vm0, %v4180_v59 }
 0x8f6   :  { %v4176_v50 = vpop.f32.mrb[50].mxu1 }
 0x8f7   :  { %v4177_v60 = vadd.f32 %v4316_v58, %v4176_v50  ;;  %v4958_v61 = vpop.f32.mrb[51].mxu1 }
 0x8f9   :  { %v4181_v62 = vadd.f32 %v4177_v60, %v5833_v55 }
 0x8fb   :  { %4183 = vst.msk [vmem:[#allocation2 + $0x8] sm:$0xff] %vm43_vm0, %v4181_v62 }
 0x8fc   :  { %5199 = shalt.err (!%p5196_p4)
}
 0x8fd   :  { %s5200_s29 = scalar_lea.hbm %s5930_s9, 256 }
 0x8fe   :  { %p5201_p5 = scmp.ne.s32.totalorder %s5930_s9, %s5200_s29  ;;  %p5204_p6 = scmp.lt.u32.totalorder %s5200_s29, %s5930_s9 }
 0x900   :  { %p5206_p7 = pnand %p5204_p6, %p5201_p5 }
 0x902   :  { %5209 = shalt.err (!%p5206_p7)
}
 0x903   :  { %s5217_s11 = smov 128   ;;  %s5218_s3 = smov 8  }
 0x904   :  { %4195 = dma.vmem_to_hbm [thread:$0]  %s4190_s27, 256, %s5930_s9, [#allocation3], %s5217_s11, %s5217_s11, %s5218_s3  }
 0x905   :  { %5210 = dma.done.wait [#allocation3], 256  }
 0x906   :  { %5211 = vsyncadd [#allocation3], 4294967040 }
 0x907   :  { %4199 = vsyncpa [#allocation3], 1 }

</bundles_post_ra>
